<compile_context>
chip_gen: v7x
topology: tpu7x:2x2x1
jax: 0.10.0
libtpu: 0.0.40
codegen_flags: <defaults>
</compile_context>

<pallas_src>
import functools

import jax
import jax.numpy as jnp
from jax.experimental import pallas as pl
from jax.experimental.pallas import tpu as pltpu

# ----------------------------- config ---------------------------------------
EDGE_DIM = 8            # cfg.EDGE_DIM
OUT_CHANNELS = 64       # module default
C_PAD = 128             # lane-dense padded channel count
IN_FEATURES = 16
NODES_PER_GRAPH = 8
N_GRAPHS = 32           # total graphs batched into one pallas_call
NODES_PER_BLOCK = 128   # M tile per grid step (multiple of 128; use 256 on v6e/v7x at larger N)
NEG_SLOPE = 0.2
NEG_INF = -1e30


# ----------------------------- Pallas kernel --------------------------------
def _gat_kernel(x_ref, e_ref, w1_ref, w2_ref, vec_ref, out_ref, *,
                graphs_per_block, nodes_per_graph):
    """Two GAT layers + global add pool for one block of whole graphs.

    x_ref:   [NB, F_in]        bf16 node features of this block
    e_ref:   [1, 2, NB, NB]    f32 per-layer dense edge scores, NEG_INF = no edge
    w1_ref:  [F_in, C_PAD]     bf16 layer-1 weights (lanes >= C are zero)
    w2_ref:  [C_PAD, C_PAD]    bf16 layer-2 weights
    vec_ref: [8, C_PAD]        f32 rows: as1, ad1, b1, as2, ad2, b2, 0, 0
    out_ref: [graphs_per_block, C_PAD] pooled graph embeddings
    """
    vec = vec_ref[...]
    as1, ad1, b1 = vec[0:1, :], vec[1:2, :], vec[2:3, :]
    as2, ad2, b2 = vec[3:4, :], vec[4:5, :], vec[5:6, :]

    def gat_layer(x_bf16, w_bf16, att_src, att_dst, bias, e):
        # bf16 MXU matmul, f32 accumulation
        h = jnp.dot(x_bf16, w_bf16, preferred_element_type=jnp.float32)   # [NB, Cp]
        # destination score: VPU multiply + lane reduce -> [NB, 1] (off the MXU)
        a_dst = jnp.sum(h * att_dst, axis=-1, keepdims=True)
        # source score as a row [1, NB]; a VPU version would need an XLU transpose.
        a_src = jax.lax.dot_general(att_src, h, (((1,), (1,)), ((), ())),
                                    preferred_element_type=jnp.float32)
        s = a_dst + a_src + e                                             # [NB, NB] f32
        s = jnp.where(s > 0, s, NEG_SLOPE * s)                            # leaky relu
        # non-edges carry NEG_INF from the host; exp -> 0 (every row has a self loop)
        m = jnp.max(s, axis=-1, keepdims=True)
        p = jnp.exp(s - m)
        denom = jnp.sum(p, axis=-1, keepdims=True)                        # [NB, 1]
        agg = jnp.dot(p.astype(jnp.bfloat16), h.astype(jnp.bfloat16),
                      preferred_element_type=jnp.float32)                 # [NB, Cp] MXU
        out = agg * pl.reciprocal(denom, approx=True)                     # EUP, free slot
        return out + bias

    e1 = e_ref[0, 0]
    e2 = e_ref[0, 1]
    h1 = gat_layer(x_ref[...], w1_ref[...], as1, ad1, b1, e1)
    h2 = gat_layer(h1.astype(jnp.bfloat16), w2_ref[...], as2, ad2, b2, e2)

    # global_add_pool over contiguous 8-node graphs: one sublane reduce + one full store.
    pooled = jnp.sum(
        h2.reshape(graphs_per_block, nodes_per_graph, h2.shape[-1]), axis=1)
    out_ref[...] = pooled


def gat_forward_pallas(x_bf, e_blocks, w1_bf, w2_bf, vec_pack, *,
                       nodes_per_block, graphs_per_block, nodes_per_graph):
    n_blocks = e_blocks.shape[0]
    n_graphs = n_blocks * graphs_per_block
    fin = x_bf.shape[1]
    cp = w1_bf.shape[1]

    kernel = functools.partial(_gat_kernel,
                               graphs_per_block=graphs_per_block,
                               nodes_per_graph=nodes_per_graph)

    nb = nodes_per_block
    flops = int(n_blocks * (2 * nb * fin * cp          # layer-1 x @ W1
                            + 2 * nb * cp * cp         # layer-2 h1 @ W2
                            + 2 * 2 * nb * nb * cp))   # two p @ h aggregations
    transcendentals = int(n_blocks * 2 * nb * nb)      # exp per layer
    bytes_accessed = int(x_bf.size * 2 + e_blocks.size * 4
                         + n_blocks * (w1_bf.size * 2 + w2_bf.size * 2
                                       + vec_pack.size * 4)
                         + n_graphs * cp * 4)

    return pl.pallas_call(
        kernel,
        out_shape=jax.ShapeDtypeStruct((n_graphs, cp), jnp.float32),
        grid_spec=pltpu.PrefetchScalarGridSpec(
            num_scalar_prefetch=0,
            grid=(n_blocks,),
            in_specs=[
                pl.BlockSpec((nb, fin), lambda b: (b, 0)),
                pl.BlockSpec((1, 2, nb, nb), lambda b: (b, 0, 0, 0)),
                pl.BlockSpec((fin, cp), lambda b: (0, 0)),
                pl.BlockSpec((cp, cp), lambda b: (0, 0)),
                pl.BlockSpec((8, cp), lambda b: (0, 0)),
            ],
            out_specs=pl.BlockSpec((graphs_per_block, cp), lambda b: (b, 0)),
        ),
        compiler_params=pltpu.CompilerParams(
            dimension_semantics=("parallel",)),        # shard blocks over v7x TCs
        cost_estimate=pl.CostEstimate(
            flops=flops, transcendentals=transcendentals,
            bytes_accessed=bytes_accessed),
    )(x_bf, e_blocks, w1_bf, w2_bf, vec_pack)


# ----------------------------- JAX glue --------------------------------------
def dense_edge_scores_both(edge_attr, src, dst, n_nodes, we1, ae1, we2, ae2):
    """Dense per-edge attention terms for BOTH layers via one-hot matmuls (no scatter).

    Returns [2, N, N] with NEG_INF where there is no edge (mask folded in).
    Self loops use PyG fill_value='mean' (mean of incoming edge attrs, 0 if none).
    """
    # TODO(synk): sparse edge-index handling + mean self-loop fill has no clean
    # in-kernel Pallas equivalent at this size; done once on the MXU via one-hots.
    v = jnp.stack([we1 @ ae1, we2 @ ae2], axis=1)                        # [Ed, 2]
    ae_edges = edge_attr @ v                                             # [E, 2]
    node_ids = jnp.arange(n_nodes, dtype=jnp.int32)
    src_oh = (src[:, None] == node_ids[None, :]).astype(jnp.float32)     # [E, N]
    dst_oh = (dst[:, None] == node_ids[None, :]).astype(jnp.float32)     # [E, N]
    adj = dst_oh.T @ src_oh                                              # [N, N]
    s1 = dst_oh.T @ (ae_edges[:, 0:1] * src_oh)                          # [N, N]
    s2 = dst_oh.T @ (ae_edges[:, 1:2] * src_oh)
    sums = dst_oh.T @ edge_attr                                          # [N, Ed]
    cnts = jnp.sum(dst_oh, axis=0)                                       # [N]
    loop_attr = sums / jnp.maximum(cnts, 1.0)[:, None]
    ae_loop = loop_attr @ v                                              # [N, 2]
    eye = jnp.eye(n_nodes, dtype=jnp.float32)
    score = jnp.stack([s1, s2], axis=0) + eye[None, :, :] * ae_loop.T[:, :, None]
    mask = (adj > 0) | (eye > 0)
    return jnp.where(mask[None, :, :], score, NEG_INF)


def reference_forward(x, e_full, params, n_graphs):
    """Pure-JAX f32 reference with identical dense semantics (unpadded C)."""
    (w1, as1, ad1, b1, w2, as2, ad2, b2) = params

    def layer(x, w, a_s, a_d, b, e):
        h = x @ w
        s = (h @ a_d) + (a_s @ h.T) + e
        s = jnp.where(s > 0, s, NEG_SLOPE * s)
        s = s - jnp.max(s, axis=-1, keepdims=True)
        p = jnp.exp(s)
        alpha = p / jnp.sum(p, axis=-1, keepdims=True)
        return alpha @ h + b

    h1 = layer(x, w1, as1, ad1, b1, e_full[0])
    h2 = layer(h1, w2, as2, ad2, b2, e_full[1])
    return h2.reshape(n_graphs, -1, h2.shape[-1]).sum(axis=1)


def pad_to(a, shape):
    return jnp.pad(a, [(0, t - s) for s, t in zip(a.shape, shape)])


# ----------------------------- main ------------------------------------------
if __name__ == "__main__":
    key = jax.random.PRNGKey(0)
    keys = jax.random.split(key, 16)

    G, NPG, Fin, C, Cp, Ed = N_GRAPHS, NODES_PER_GRAPH, IN_FEATURES, OUT_CHANNELS, C_PAD, EDGE_DIM
    N = G * NPG                               # 256 nodes total
    NB = NODES_PER_BLOCK                      # 128 nodes per grid step
    n_blocks = N // NB                        # 2
    graphs_per_block = NB // NPG              # 16

    # node features, 8 nodes per graph (contiguous blocks)
    x = jax.random.normal(keys[0], (N, Fin), jnp.float32)

    # deterministic directed edge list: per-graph ring + chords (no self loops)
    src_list, dst_list = [], []
    for g in range(G):
        off = g * NPG
        for i in range(NPG):
            src_list += [off + i, off + i]
            dst_list += [off + (i + 1) % NPG, off + (i + 2) % NPG]
    src = jnp.asarray(src_list, jnp.int32)
    dst = jnp.asarray(dst_list, jnp.int32)
    E = src.shape[0]
    edge_attr = jax.random.normal(keys[1], (E, Ed), jnp.float32)

    def init(k, shape, scale=0.1):
        return scale * jax.random.normal(k, shape, jnp.float32)

    # layer 1 (in = Fin), layer 2 (in = C)
    w1 = init(keys[2], (Fin, C)); w2 = init(keys[3], (C, C))
    as1 = init(keys[4], (1, C));  ad1 = init(keys[5], (C, 1))
    as2 = init(keys[6], (1, C));  ad2 = init(keys[7], (C, 1))
    b1 = init(keys[8], (1, C));   b2 = init(keys[9], (1, C))
    we1 = init(keys[10], (Ed, C)); ae1 = init(keys[11], (C,))
    we2 = init(keys[12], (Ed, C)); ae2 = init(keys[13], (C,))

    # dense per-edge attention scores for both layers (mask folded in as NEG_INF)
    e_full = dense_edge_scores_both(edge_attr, src, dst, N, we1, ae1, we2, ae2)
    # per-block score maps: graphs never span blocks, so attention is block-diagonal
    e_blocks = jnp.stack([
        jax.lax.dynamic_slice(e_full, (0, b * NB, b * NB), (2, NB, NB))
        for b in range(n_blocks)])                                       # [B, 2, NB, NB]

    # one-time packing: bf16 MXU operands (padding stays exactly zero), f32 vectors
    x_bf = x.astype(jnp.bfloat16)                                        # [N, Fin]
    w1_bf = pad_to(w1, (Fin, Cp)).astype(jnp.bfloat16)                   # [Fin, Cp]
    w2_bf = pad_to(w2, (Cp, Cp)).astype(jnp.bfloat16)                    # [Cp, Cp]
    vec_rows = jnp.stack([as1[0], ad1[:, 0], b1[0],
                          as2[0], ad2[:, 0], b2[0]])                     # [6, C]
    vec_pack = jnp.zeros((8, Cp), jnp.float32).at[:6, :C].set(vec_rows)

    out_full = gat_forward_pallas(x_bf, e_blocks, w1_bf, w2_bf, vec_pack,
                                  nodes_per_block=NB,
                                  graphs_per_block=graphs_per_block,
                                  nodes_per_graph=NPG)
    out = jax.block_until_ready(out_full)[:, :C]

    params = (w1, as1, ad1, b1, w2, as2, ad2, b2)
    ref = reference_forward(x, e_full, params, G)

    assert out.shape == (G, C), out.shape
    # tolerance absorbs bf16 MXU operands + approx reciprocal in the softmax denom
    assert jnp.allclose(out, ref, rtol=2e-2, atol=2e-2), \
        f"max abs diff {jnp.max(jnp.abs(out - ref))}"

    print("KERNEL_OK")
</pallas_src>

<mosaic_0001>
module attributes {stable_mosaic.version = 11 : i64} {
  func.func @_gat_kernel(%arg0: i32, %arg1: memref<128x16xbf16, #tpu.memory_space<vmem>>, %arg2: memref<1x2x128x128xf32, #tpu.memory_space<vmem>>, %arg3: memref<16x128xbf16, #tpu.memory_space<vmem>>, %arg4: memref<128x128xbf16, #tpu.memory_space<vmem>>, %arg5: memref<8x128xf32, #tpu.memory_space<vmem>>, %arg6: memref<16x128xf32, #tpu.memory_space<vmem>>) attributes {dimension_semantics = [#tpu.dimension_semantics<parallel>], iteration_bounds = array<i64: 2>, scalar_prefetch = 0 : i64, scratch_operands = 0 : i64, tpu.core_type = #tpu.core_type<tc>, window_params = [{transform_indices = @transform_0, window_bounds = array<i64: 128, 16>}, {transform_indices = @transform_1, window_bounds = array<i64: 1, 2, 128, 128>}, {pipeline_mode = #tpu.pipeline_mode<synchronous>, transform_indices = @transform_2, window_bounds = array<i64: 16, 128>}, {pipeline_mode = #tpu.pipeline_mode<synchronous>, transform_indices = @transform_3, window_bounds = array<i64: 128, 128>}, {pipeline_mode = #tpu.pipeline_mode<synchronous>, transform_indices = @transform_4, window_bounds = array<i64: 8, 128>}, {transform_indices = @transform_5, window_bounds = array<i64: 16, 128>}]} {
    %c0 = arith.constant 0 : index
    %c0_0 = arith.constant 0 : index
    %0 = vector.load %arg5[%c0, %c0_0] : memref<8x128xf32, #tpu.memory_space<vmem>>, vector<8x128xf32>
    %1 = vector.extract_strided_slice %0 {offsets = [0, 0], sizes = [1, 128], strides = [1, 1]} : vector<8x128xf32> to vector<1x128xf32>
    %2 = vector.extract_strided_slice %0 {offsets = [1, 0], sizes = [1, 128], strides = [1, 1]} : vector<8x128xf32> to vector<1x128xf32>
    %3 = vector.extract_strided_slice %0 {offsets = [2, 0], sizes = [1, 128], strides = [1, 1]} : vector<8x128xf32> to vector<1x128xf32>
    %4 = vector.extract_strided_slice %0 {offsets = [3, 0], sizes = [1, 128], strides = [1, 1]} : vector<8x128xf32> to vector<1x128xf32>
    %5 = vector.extract_strided_slice %0 {offsets = [4, 0], sizes = [1, 128], strides = [1, 1]} : vector<8x128xf32> to vector<1x128xf32>
    %6 = vector.extract_strided_slice %0 {offsets = [5, 0], sizes = [1, 128], strides = [1, 1]} : vector<8x128xf32> to vector<1x128xf32>
    %c0_1 = arith.constant 0 : index
    %c0_2 = arith.constant 0 : index
    %c0_3 = arith.constant 0 : index
    %c0_4 = arith.constant 0 : index
    %7 = vector.load %arg2[%c0_1, %c0_2, %c0_3, %c0_4] : memref<1x2x128x128xf32, #tpu.memory_space<vmem>>, vector<1x1x128x128xf32>
    %8 = vector.shape_cast %7 : vector<1x1x128x128xf32> to vector<128x128xf32>
    %c0_5 = arith.constant 0 : index
    %c1 = arith.constant 1 : index
    %c0_6 = arith.constant 0 : index
    %c0_7 = arith.constant 0 : index
    %9 = vector.load %arg2[%c0_5, %c1, %c0_6, %c0_7] : memref<1x2x128x128xf32, #tpu.memory_space<vmem>>, vector<1x1x128x128xf32>
    %10 = vector.shape_cast %9 : vector<1x1x128x128xf32> to vector<128x128xf32>
    %c0_8 = arith.constant 0 : index
    %c0_9 = arith.constant 0 : index
    %11 = vector.load %arg1[%c0_8, %c0_9] : memref<128x16xbf16, #tpu.memory_space<vmem>>, vector<128x16xbf16>
    %c0_10 = arith.constant 0 : index
    %c0_11 = arith.constant 0 : index
    %12 = vector.load %arg3[%c0_10, %c0_11] : memref<16x128xbf16, #tpu.memory_space<vmem>>, vector<16x128xbf16>
    %cst = arith.constant dense<0.000000e+00> : vector<128x128xf32>
    %13 = tpu.matmul %11, %12, %cst {dimension_numbers = #tpu.dot_dimension_numbers<[1], [0], [0], [1], [0, 0, 1, 1], [], []>} : vector<128x16xbf16>, vector<16x128xbf16>, vector<128x128xf32> -> vector<128x128xf32>
    %14 = vector.broadcast %2 : vector<1x128xf32> to vector<128x128xf32>
    %15 = arith.mulf %13, %14 : vector<128x128xf32>
    %cst_12 = arith.constant dense<0.000000e+00> : vector<128xf32>
    %16 = vector.multi_reduction <add>, %15, %cst_12 [1] : vector<128x128xf32> to vector<128xf32>
    %17 = vector.shape_cast %16 : vector<128xf32> to vector<128x1xf32>
    %cst_13 = arith.constant dense<0.000000e+00> : vector<1x128xf32>
    %18 = tpu.matmul %1, %13, %cst_13 {dimension_numbers = #tpu.dot_dimension_numbers<[1], [1], [0], [0], [0, 0, 1, 0], [], []>} : vector<1x128xf32>, vector<128x128xf32>, vector<1x128xf32> -> vector<1x128xf32>
    %19 = vector.broadcast %17 : vector<128x1xf32> to vector<128x128xf32>
    %20 = vector.broadcast %18 : vector<1x128xf32> to vector<128x128xf32>
    %21 = arith.addf %19, %20 : vector<128x128xf32>
    %22 = arith.addf %21, %8 : vector<128x128xf32>
    %cst_14 = arith.constant 0.000000e+00 : f32
    %23 = vector.broadcast %cst_14 : f32 to vector<128x128xf32>
    %24 = arith.cmpf ogt, %22, %23 : vector<128x128xf32>
    %cst_15 = arith.constant 2.000000e-01 : f32
    %25 = vector.broadcast %cst_15 : f32 to vector<128x128xf32>
    %26 = arith.mulf %25, %22 : vector<128x128xf32>
    %27 = arith.select %24, %22, %26 : vector<128x128xi1>, vector<128x128xf32>
    %cst_16 = arith.constant dense<0xFF800000> : vector<128xf32>
    %28 = vector.multi_reduction <maximumf>, %27, %cst_16 [1] : vector<128x128xf32> to vector<128xf32>
    %29 = vector.shape_cast %28 : vector<128xf32> to vector<128x1xf32>
    %30 = vector.broadcast %29 : vector<128x1xf32> to vector<128x128xf32>
    %31 = arith.subf %27, %30 : vector<128x128xf32>
    %32 = math.exp %31 : vector<128x128xf32>
    %cst_17 = arith.constant dense<0.000000e+00> : vector<128xf32>
    %33 = vector.multi_reduction <add>, %32, %cst_17 [1] : vector<128x128xf32> to vector<128xf32>
    %34 = vector.shape_cast %33 : vector<128xf32> to vector<128x1xf32>
    %35 = arith.truncf %32 : vector<128x128xf32> to vector<128x128xbf16>
    %36 = arith.truncf %13 : vector<128x128xf32> to vector<128x128xbf16>
    %cst_18 = arith.constant dense<0.000000e+00> : vector<128x128xf32>
    %37 = tpu.matmul %35, %36, %cst_18 {dimension_numbers = #tpu.dot_dimension_numbers<[1], [0], [0], [1], [0, 0, 1, 1], [], []>} : vector<128x128xbf16>, vector<128x128xbf16>, vector<128x128xf32> -> vector<128x128xf32>
    %38 = tpu.reciprocal %34 {approx = true} : vector<128x1xf32> -> vector<128x1xf32>
    %39 = vector.broadcast %38 : vector<128x1xf32> to vector<128x128xf32>
    %40 = arith.mulf %37, %39 : vector<128x128xf32>
    %41 = vector.broadcast %3 : vector<1x128xf32> to vector<128x128xf32>
    %42 = arith.addf %40, %41 : vector<128x128xf32>
    %43 = arith.truncf %42 : vector<128x128xf32> to vector<128x128xbf16>
    %c0_19 = arith.constant 0 : index
    %c0_20 = arith.constant 0 : index
    %44 = vector.load %arg4[%c0_19, %c0_20] : memref<128x128xbf16, #tpu.memory_space<vmem>>, vector<128x128xbf16>
    %cst_21 = arith.constant dense<0.000000e+00> : vector<128x128xf32>
    %45 = tpu.matmul %43, %44, %cst_21 {dimension_numbers = #tpu.dot_dimension_numbers<[1], [0], [0], [1], [0, 0, 1, 1], [], []>} : vector<128x128xbf16>, vector<128x128xbf16>, vector<128x128xf32> -> vector<128x128xf32>
    %46 = vector.broadcast %5 : vector<1x128xf32> to vector<128x128xf32>
    %47 = arith.mulf %45, %46 : vector<128x128xf32>
    %cst_22 = arith.constant dense<0.000000e+00> : vector<128xf32>
    %48 = vector.multi_reduction <add>, %47, %cst_22 [1] : vector<128x128xf32> to vector<128xf32>
    %49 = vector.shape_cast %48 : vector<128xf32> to vector<128x1xf32>
    %cst_23 = arith.constant dense<0.000000e+00> : vector<1x128xf32>
    %50 = tpu.matmul %4, %45, %cst_23 {dimension_numbers = #tpu.dot_dimension_numbers<[1], [1], [0], [0], [0, 0, 1, 0], [], []>} : vector<1x128xf32>, vector<128x128xf32>, vector<1x128xf32> -> vector<1x128xf32>
    %51 = vector.broadcast %49 : vector<128x1xf32> to vector<128x128xf32>
    %52 = vector.broadcast %50 : vector<1x128xf32> to vector<128x128xf32>
    %53 = arith.addf %51, %52 : vector<128x128xf32>
    %54 = arith.addf %53, %10 : vector<128x128xf32>
    %cst_24 = arith.constant 0.000000e+00 : f32
    %55 = vector.broadcast %cst_24 : f32 to vector<128x128xf32>
    %56 = arith.cmpf ogt, %54, %55 : vector<128x128xf32>
    %cst_25 = arith.constant 2.000000e-01 : f32
    %57 = vector.broadcast %cst_25 : f32 to vector<128x128xf32>
    %58 = arith.mulf %57, %54 : vector<128x128xf32>
    %59 = arith.select %56, %54, %58 : vector<128x128xi1>, vector<128x128xf32>
    %cst_26 = arith.constant dense<0xFF800000> : vector<128xf32>
    %60 = vector.multi_reduction <maximumf>, %59, %cst_26 [1] : vector<128x128xf32> to vector<128xf32>
    %61 = vector.shape_cast %60 : vector<128xf32> to vector<128x1xf32>
    %62 = vector.broadcast %61 : vector<128x1xf32> to vector<128x128xf32>
    %63 = arith.subf %59, %62 : vector<128x128xf32>
    %64 = math.exp %63 : vector<128x128xf32>
    %cst_27 = arith.constant dense<0.000000e+00> : vector<128xf32>
    %65 = vector.multi_reduction <add>, %64, %cst_27 [1] : vector<128x128xf32> to vector<128xf32>
    %66 = vector.shape_cast %65 : vector<128xf32> to vector<128x1xf32>
    %67 = arith.truncf %64 : vector<128x128xf32> to vector<128x128xbf16>
    %68 = arith.truncf %45 : vector<128x128xf32> to vector<128x128xbf16>
    %cst_28 = arith.constant dense<0.000000e+00> : vector<128x128xf32>
    %69 = tpu.matmul %67, %68, %cst_28 {dimension_numbers = #tpu.dot_dimension_numbers<[1], [0], [0], [1], [0, 0, 1, 1], [], []>} : vector<128x128xbf16>, vector<128x128xbf16>, vector<128x128xf32> -> vector<128x128xf32>
    %70 = tpu.reciprocal %66 {approx = true} : vector<128x1xf32> -> vector<128x1xf32>
    %71 = vector.broadcast %70 : vector<128x1xf32> to vector<128x128xf32>
    %72 = arith.mulf %69, %71 : vector<128x128xf32>
    %73 = vector.broadcast %6 : vector<1x128xf32> to vector<128x128xf32>
    %74 = arith.addf %72, %73 : vector<128x128xf32>
    %75 = vector.shape_cast %74 : vector<128x128xf32> to vector<16x8x128xf32>
    %cst_29 = arith.constant dense<0.000000e+00> : vector<16x128xf32>
    %76 = vector.multi_reduction <add>, %75, %cst_29 [1] : vector<16x8x128xf32> to vector<16x128xf32>
    %c0_30 = arith.constant 0 : index
    %c0_31 = arith.constant 0 : index
    %77 = vector.load %arg6[%c0_30, %c0_31] : memref<16x128xf32, #tpu.memory_space<vmem>>, vector<16x128xf32>
    tpu.vector_store %arg6[%c0_30, %c0_31], %76 {strides = array<i32>} : memref<16x128xf32, #tpu.memory_space<vmem>>, vector<16x128xf32>,
    return
  }
  func.func @transform_0(%arg0: i32) -> (i32, i32) {
    %c0_i32 = arith.constant 0 : i32
    %c0_i32_0 = arith.constant 0 : i32
    return %arg0, %c0_i32 : i32, i32
  }
  func.func @transform_1(%arg0: i32) -> (i32, i32, i32, i32) {
    %c0_i32 = arith.constant 0 : i32
    %c0_i32_0 = arith.constant 0 : i32
    %c0_i32_1 = arith.constant 0 : i32
    %c0_i32_2 = arith.constant 0 : i32
    return %arg0, %c0_i32, %c0_i32_0, %c0_i32_1 : i32, i32, i32, i32
  }
  func.func @transform_2(%arg0: i32) -> (i32, i32) {
    %c0_i32 = arith.constant 0 : i32
    %c0_i32_0 = arith.constant 0 : i32
    %c0_i32_1 = arith.constant 0 : i32
    return %c0_i32, %c0_i32_0 : i32, i32
  }
  func.func @transform_3(%arg0: i32) -> (i32, i32) {
    %c0_i32 = arith.constant 0 : i32
    %c0_i32_0 = arith.constant 0 : i32
    %c0_i32_1 = arith.constant 0 : i32
    return %c0_i32, %c0_i32_0 : i32, i32
  }
  func.func @transform_4(%arg0: i32) -> (i32, i32) {
    %c0_i32 = arith.constant 0 : i32
    %c0_i32_0 = arith.constant 0 : i32
    %c0_i32_1 = arith.constant 0 : i32
    return %c0_i32, %c0_i32_0 : i32, i32
  }
  func.func @transform_5(%arg0: i32) -> (i32, i32) {
    %c0_i32 = arith.constant 0 : i32
    %c0_i32_0 = arith.constant 0 : i32
    return %arg0, %c0_i32 : i32, i32
  }
}

</mosaic_0001>

<bundles_post_ra>
// kernel: tpu_custom_call.1
= control target key start
LH: loop header
LB: loop body
LE: loop exit
PB: predicated region body
PF: predicated region fallthrough
CT: control target
= control target key end

     0   :  { %10 = vsyncpa [#allocation3], 0  ;;  %s3120_s0 = inlined_call_operand.vmem [shape: bf16[256,16], index: 0, kind: input, shape index: {}]   ;;  %s3121_s1 = inlined_call_operand.hbm [shape: f32[2,2,128,128], index: 1, kind: input, shape index: {}]   ;;  %s3122_s2 = inlined_call_operand.vmem [shape: bf16[16,128], index: 2, kind: input, shape index: {}]   ;;  %s3123_s3 = inlined_call_operand.vmem [shape: bf16[128,128], index: 3, kind: input, shape index: {}]   ;;  %s3124_s4 = inlined_call_operand.vmem [shape: f32[8,128], index: 4, kind: input, shape index: {}]   ;;  %s3125_s5 = inlined_call_operand.hbm [shape: f32[32,128], index: 5, kind: output, shape index: {}]  }
   0x1   :  { %12 = vsyncpa [#allocation3 + $0x1], 0 }
   0x2   :  { %13 = vsyncpa [#allocation4], 0 }
   0x3   :  { %15 = vsyncpa [#allocation4 + $0x1], 0  ;;  %s2579_s18 = smov 0   ;;  %s2581_s19 = smov 0  }
   0x4   :  { %s2583_s20 = smov 0   ;;  %s2585_s21 = smov 0  }
   0x5 LB: > { %s2600_s22 = sadd.s32 4294967295, %s2538_s21   ;;  %s1861_s23 = sadd.s32 4294967294, %s2538_s21   ;;  %s2538_s21 = sphi %s2585_s21, %s3138_s21   ;;  %s2534_s20 = sphi %s2583_s20, %s3137_s20   ;;  %s2530_s19 = sphi %s2581_s19, %s3136_s19   ;;  %s2526_s18 = sphi %s2579_s18, %s3135_s18  }
   0x6   : > { %s2604_s24 = sadd.s32 1, %s2538_s21   ;;  %s54_s25 = sadd.s32 1, %s2534_s20 }
   0x7   : > { %s51_s26 = ssub.s32 %s2538_s21, %s2604_s24  ;;  %p61_p0 = scmp.ne.s32.totalorder %s2534_s20, %s2530_s19 }
   0x8   : > { %p52_p1 = scmp.eq.s32.totalorder %s51_s26, 0  ;;  %p62_p2 = scmp.eq.s32.totalorder %s2538_s21, 0 }
   0x9   : > { %p67_p3 = scmp.ne.s32.totalorder %s2530_s19, %s2526_s18  ;;  %p68_p4 = scmp.eq.s32.totalorder %s2600_s22, 0 }
   0xa   : > { %s2616_s27 = scalar_select %p52_p1, %s2534_s20, %s54_s25  }
   0xb   : > { %p2618_p5 = por %p62_p2, %p61_p0  ;;  %p2622_p6 = por %p68_p4, %p67_p3 }
   0xc   : > { %p154_p7 = scmp.eq.s32.totalorder %s2600_s22, 1  ;;  %p160_p8 = scmp.eq.s32.totalorder %s1861_s23, 1 }
   0xd   : > { %p2255_p10 = scmp.lt.s32.totalorder %s2538_s21, 2  ;;  %s198_s7 = sand.u32 1, %s2534_s20  }
   0xe   : > { %p2629_p11 = por %p154_p7, %p61_p0  ;;  %p2633_p12 = por %p160_p8, %p67_p3 }
   0xf   : > { %s1918_s8 = sshll.u32 %s2538_s21, 12  ;;  %s1864_s9 = sshll.u32 %s198_s7, 8 }
  0x10   : > { %s3129_s30 = scalar_select %p2629_p11, 1, 0 }
  0x11   : > { %s3130_s6 = scalar_select %p2633_p12, 1, 0 }
  0x12   : > { %s2642_s12 = scalar_lea.hbm %s3121_s1, %s1918_s8  ;;  %s202_s13 = scalar_lea.vmem [#allocation2], %s1864_s9 }
  0x13   : > { %s209_s14 = sshll.u32 %s202_s13, 4  ;;  %p2646_p13 = pnand %p2255_p10, %p2618_p5  ;;  %s2650_s14 = int_to_ptr.vmem [resolvable:$true] %s209_s14 }
  0x14   : > { %s2652_s16 = scalar_lea.sflag [#allocation3], %s198_s7  ;;  %s2442_s17 = scalar_lea.hbm %s2642_s12, 4096 }
  0x15   : > { %p2443_p0 = scmp.ne.s32.totalorder %s2642_s12, %s2442_s17  ;;  %p2444_p1 = pneg %p2646_p13 }
  0x16   : > { %s2447_s26 = scalar_lea.hbm %s3121_s1, 8192  ;;  %p2448_p4 = scmp.lt.u32.totalorder %s2642_s12, %s3121_s1 }
  0x17   : > { %p2445_p2 = pnand %p2444_p1, %p2443_p0  ;;  %p2449_p5 = scmp.lt.u32.totalorder %s2447_s26, %s2442_s17 }
  0x18   : > { %p2451_p8 = scmp.lt.u32.totalorder %s2442_s17, %s2642_s12 }
  0x19   : > { %p2446_p3 = pneg %p2445_p2  ;;  %p2450_p7 = por %p2449_p5, %p2448_p4 }
  0x1b   : > { %p2452_p10 = por %p2451_p8, %p2450_p7 }
  0x1d   : > { %p2453_p9 = pnand %p2452_p10, %p2446_p3 }
  0x1f   : > { %2456 = shalt.err (!%p2453_p9)
}
  0x20   : > { %s2457_s7 = scalar_lea.vmem %s2650_s14, 4096  ;;  %s2540_s9 = smov [#allocation2]  }
  0x21   : > { %p2458_p0 = scmp.ne.s32.totalorder %s2650_s14, %s2457_s7  ;;  %s2462_s10 = sshll.u32 %s2540_s9, 4  ;;  %s2463_s10 = int_to_ptr.vmem [resolvable:$false] %s2462_s10 }
  0x22   : > { %s2464_s11 = scalar_lea.vmem %s2463_s10, 8192  ;;  %p2465_p11 = scmp.lt.s32.totalorder %s2650_s14, %s2463_s10 }
  0x23   : > { %p2460_p2 = pnand %p2458_p0, %p2444_p1  ;;  %p2466_p4 = scmp.lt.s32.totalorder %s2464_s11, %s2457_s7 }
  0x25   : > { %p2461_p12 = pneg %p2460_p2  ;;  %p2467_p5 = por %p2466_p4, %p2465_p11 }
  0x27   : > { %p2468_p7 = pnand %p2467_p5, %p2461_p12 }
  0x29   : > { %2471 = shalt.err (!%p2468_p7)
}
  0x2a   : > { %s2541_s13 = smov 128   ;;  %s2542_s17 = smov 8  }
  0x2b   : > { %2250 = dma.hbm_to_vmem [thread:$0]  (!%p2646_p13), %s2642_s12, 4096, %s2650_s14, %s2652_s16, %s2541_s13, %s2541_s13, %s2542_s17  }
  0x2c   : > { %p1867_p9 = scmp.ge.s32.totalorder %s2538_s21, 1  ;;  %p217_p1 = scmp.lt.s32.totalorder %s2538_s21, 3 }
  0x2e   : > { %p218_p3 = pnand %p1867_p9, %p217_p1 }
  0x2f   : > { %s2683_s23 = sand.u32 (!%p218_p3), 1, %s2530_s19  }
  0x30   : > { %221 = sbr.rel (%p218_p3) target bundleno = 1892 (0x764), region = 40  ;;  %s1868_s25 = sshll.u32 (!%p218_p3), %s2683_s23, 8 }
  0x31   : > { %s224_s26 = scalar_lea.sflag (!%p218_p3), [#allocation3], %s2683_s23  ;;  %s2687_s28 = scalar_lea.vmem (!%p218_p3), [#allocation2], %s1868_s25 }
  0x37   : > { %2517 = dma.done.wait (%p2622_p6), %s224_s26, 4096  }
  0x38   : > { %2519 = vsyncadd (%p2622_p6), %s224_s26, 4294963200  ;;  %s1870_s12 = sshll.u32 %s2600_s22, 4  ;;  %v2296_v0 = vld [vmem:[%s3122_s2] sm:$0xff]   ;;  %vm365_vm0 = vcmask 130048   ;;  %v2543_v9 = vmov 0.0|0.0   ;;  %vm2544_vm1 = vmmov 0   ;;  %v487_v11 = vlaneseq }
  0x39   : > { %p260_p11 = scmp.lt.s32.totalorder %s1870_s12, 31  ;;  %2011 = vmatprep.subr.bf16.mxu0 %v2296_v0  ;;  %2195 = vmatprep.subr.bf16.mxu1 %v2543_v9  ;;  %v2545_v10 = vmov 0.0   ;;  %v2717_v14 = vld [vmem:[%s3124_s4] sm:$0xff]  ;;  %p3132_p12 = scmp.ne.s32.totalorder %s3129_s30, 0 }
  0x3a   : > { %2012 = vmatpush3.bf16.msra.mxu0 %v2296_v0  ;;  %2061 = vmatprep.mubr.msk.f32.mxu1 %vm2544_vm1, %v2545_v10  ;;  %v2711_v12 = vshrl.u32 %v487_v11, 7  ;;  %v273_v11 = vld [vmem:[%s2687_s28 + $0x28] sm:$0xff]  ;;  %s2546_s9 = smov [#allocation5]  }
  0x3b   : > { %s3140_s12 = smov (!%p260_p11, %s1870_s12), 31  ;;  %s2476_s29 = sshll.u32 %s2546_s9, 4  ;;  %s2477_s29 = int_to_ptr.vmem [resolvable:$false] %s2476_s29 }
  0x3c   : > { %s1871_s14 = sshll.u32 %s3140_s12, 2  ;;  %v489_v13 = vsub.s32 1, %v2711_v12  ;;  %v611_v60 = vsub.s32 0, %v2711_v12  ;;  %s1919_s12 = sshll.u32 %s2600_s22, 8 }
  0x3d   : > { %s263_s8 = scalar_lea.vmem %s3120_s0, %s1871_s14  ;;  %s1763_s22 = scalar_lea.sflag [#allocation4], %s2683_s23 }
  0x3e   : > { %v2297_v1 = vld [vmem:[%s263_s8] sm:$0xff]   ;;  %v2298_v2 = vld [vmem:[%s263_s8 + $0x8] sm:$0xff]   ;;  %v2299_v3 = vld [vmem:[%s263_s8 + $0x10] sm:$0xff]   ;;  %v2720_v15 = vrot.slane %v2717_v14, %v489_v13  ;;  %s2478_s10 = scalar_lea.vmem %s2477_s29, 512 }
  0x3f   : > { %2013 = vmatprep.mubr.msk.bf16.mxu0 %vm365_vm0, %v2297_v1  ;;  %v2300_v4 = vld [vmem:[%s263_s8 + $0x18] sm:$0xff]   ;;  %v2301_v5 = vld [vmem:[%s263_s8 + $0x20] sm:$0xff]   ;;  %v2302_v6 = vld [vmem:[%s263_s8 + $0x28] sm:$0xff]  }
  0x40   : > { %2014 = vmatmul.mubr.msk.bf16.vlgmr.msra.gmra.mrb[0].mxu0 %vm365_vm0, %v2298_v2  ;;  %v2303_v7 = vld [vmem:[%s263_s8 + $0x30] sm:$0xff]   ;;  %v2304_v8 = vld [vmem:[%s263_s8 + $0x38] sm:$0xff]   ;;  %v268_v2 = vld [vmem:[%s2687_s28] sm:$0xff]  ;;  %s3071_s8 = scalar_lea.hbm %s3125_s5, %s1919_s12 }
  0x41   : > { %2017 = vmatprep.mubr.msk.bf16.mxu0 %vm365_vm0, %v2299_v3  ;;  %v269_v3 = vld [vmem:[%s2687_s28 + $0x8] sm:$0xff] }
  0x48   : > { %2018 = vmatmul.mubr.msk.bf16.gmra.mrb[4].mxu0 %vm365_vm0, %v2300_v4  ;;  %v270_v4 = vld [vmem:[%s2687_s28 + $0x10] sm:$0xff] }
  0x49   : > { %2021 = vmatprep.mubr.msk.bf16.mxu0 %vm365_vm0, %v2301_v5  ;;  %v271_v5 = vld [vmem:[%s2687_s28 + $0x18] sm:$0xff] }
  0x50   : > { %2022 = vmatmul.mubr.msk.bf16.gmra.mrb[8].mxu0 %vm365_vm0, %v2302_v6 }
  0x51   : > { %2025 = vmatprep.mubr.msk.bf16.mxu0 %vm365_vm0, %v2303_v7 }
  0x58   : > { %2026 = vmatmul.mubr.msk.bf16.gmra.mrb[12].mxu0 %vm365_vm0, %v2304_v8 }
 0x113   : > { %v2015_v16 = vpop.f32.mrb[0].mxu0 }
 0x114   : > { %v424_v17 = vpop.f32.mrb[1].mxu0  ;;  %v493_v18 = vmul.f32 %v2015_v16, %v2720_v15 }
 0x115   : > { %v2016_v19 = vpop.f32.mrb[2].mxu0  ;;  %v491_v20 = vmul.f32 %v2720_v15, %v424_v17 }
 0x116   : > { %v2199_v21 = vpack.c.bf16 %v2016_v19, %v2015_v16  ;;  %v427_v22 = vpop.f32.mrb[3].mxu0  ;;  %511 = vadd.xlane.f32.xlu1 %v493_v18  ;;  %v494_v24 = vmul.f32 %v2016_v19, %v2720_v15 }
 0x117   : > { %v2196_v23 = vpack.c.bf16 %v427_v22, %v424_v17  ;;  %507 = vadd.xlane.f32.xlu0 %v491_v20  ;;  %v492_v25 = vmul.f32 %v2720_v15, %v427_v22  ;;  %v272_v22 = vld [vmem:[%s2687_s28 + $0x20] sm:$0xff] }
 0x119   : > { %2197 = vmatpush3.bf16.xpose.msra.mxu1 %v2196_v23  ;;  %2064 = vmatprep.subr.bf16.mxu0 %v2196_v23 }
 0x11a   : > { %2065 = vmatpush3.bf16.msra.mxu0 %v2196_v23  ;;  %513 = vadd.xlane.f32.xlu1 %v494_v24 }
 0x11b   : > { %v2019_v26 = vpop.f32.mrb[4].mxu0  ;;  %2066 = vmatprep.subr.bf16.mxu0 %v2199_v21  ;;  %509 = vadd.xlane.f32.xlu0 %v492_v25 }
 0x11c   : > { %v440_v27 = vpop.f32.mrb[5].mxu0  ;;  %2198 = vmatprep.subr.bf16.mxu1 %v2543_v9  ;;  %v497_v34 = vmul.f32 %v2019_v26, %v2720_v15 }
 0x11d   : > { %v2020_v28 = vpop.f32.mrb[6].mxu0  ;;  %v495_v29 = vmul.f32 %v2720_v15, %v440_v27 }
 0x11e   : > { %v2205_v30 = vpack.c.bf16 %v2020_v28, %v2019_v26  ;;  %v443_v31 = vpop.f32.mrb[7].mxu0  ;;  %2067 = vmatpush3.bf16.msra.mxu0 %v2199_v21  ;;  %v498_v35 = vmul.f32 %v2020_v28, %v2720_v15 }
 0x11f   : > { %v2202_v32 = vpack.c.bf16 %v443_v31, %v440_v27  ;;  %v496_v33 = vmul.f32 %v2720_v15, %v443_v31  ;;  %515 = vadd.xlane.f32.xlu0 %v495_v29 }
 0x121   : > { %2200 = vmatpush3.bf16.xpose.msra.mxu1 %v2199_v21  ;;  %2068 = vmatprep.subr.bf16.mxu0 %v2202_v32 }
 0x122   : > { %2069 = vmatpush3.bf16.msra.mxu0 %v2202_v32  ;;  %517 = vadd.xlane.f32.xlu1 %v496_v33 }
 0x123   : > { %2070 = vmatprep.subr.bf16.mxu0 %v2205_v30  ;;  %519 = vadd.xlane.f32.xlu0 %v497_v34  ;;  %v2023_v36 = vpop.f32.mrb[8].mxu0 }
 0x124   : > { %2201 = vmatprep.subr.bf16.mxu1 %v2543_v9  ;;  %v456_v37 = vpop.f32.mrb[9].mxu0  ;;  %v501_v44 = vmul.f32 %v2023_v36, %v2720_v15 }
 0x125   : > { %v2024_v38 = vpop.f32.mrb[10].mxu0  ;;  %v499_v39 = vmul.f32 %v2720_v15, %v456_v37 }
 0x126   : > { %2071 = vmatpush3.bf16.msra.mxu0 %v2205_v30  ;;  %521 = vadd.xlane.f32.xlu1 %v498_v35  ;;  %v2211_v40 = vpack.c.bf16 %v2024_v38, %v2023_v36  ;;  %v459_v41 = vpop.f32.mrb[11].mxu0  ;;  %v502_v45 = vmul.f32 %v2024_v38, %v2720_v15  ;;  %v275_v35 = vld [vmem:[%s2687_s28 + $0x38] sm:$0xff]  ;;  %v274_v36 = vld [vmem:[%s2687_s28 + $0x30] sm:$0xff] }
 0x127   : > { %v2208_v42 = vpack.c.bf16 %v459_v41, %v456_v37  ;;  %v500_v43 = vmul.f32 %v2720_v15, %v459_v41  ;;  %523 = vadd.xlane.f32.xlu0 %v499_v39 }
 0x129   : > { %2203 = vmatpush3.bf16.xpose.msra.mxu1 %v2202_v32  ;;  %2072 = vmatprep.subr.bf16.mxu0 %v2208_v42 }
 0x12a   : > { %2204 = vmatprep.subr.bf16.mxu1 %v2543_v9  ;;  %2073 = vmatpush3.bf16.msra.mxu0 %v2208_v42 }
 0x12b   : > { %525 = vadd.xlane.f32.xlu1 %v500_v43  ;;  %2074 = vmatprep.subr.bf16.mxu0 %v2211_v40  ;;  %v2027_v46 = vpop.f32.mrb[12].mxu0 }
 0x12c   : > { %527 = vadd.xlane.f32.xlu0 %v501_v44  ;;  %v472_v47 = vpop.f32.mrb[13].mxu0  ;;  %v505_v54 = vmul.f32 %v2027_v46, %v2720_v15  ;;  %v277_v44 = vld [vmem:[%s2687_s28 + $0x48] sm:$0xff] }
 0x12d   : > { %v2028_v48 = vpop.f32.mrb[14].mxu0  ;;  %v503_v49 = vmul.f32 %v2720_v15, %v472_v47 }
 0x12e   : > { %2075 = vmatpush3.bf16.msra.mxu0 %v2211_v40  ;;  %v2217_v50 = vpack.c.bf16 %v2028_v48, %v2027_v46  ;;  %v475_v51 = vpop.f32.mrb[15].mxu0  ;;  %v506_v55 = vmul.f32 %v2028_v48, %v2720_v15  ;;  %v276_v48 = vld [vmem:[%s2687_s28 + $0x40] sm:$0xff] }
 0x12f   : > { %529 = vadd.xlane.f32.xlu1 %v502_v45  ;;  %v2214_v52 = vpack.c.bf16 %v475_v51, %v472_v47  ;;  %v504_v53 = vmul.f32 %v2720_v15, %v475_v51 }
 0x130   : > { %531 = vadd.xlane.f32.xlu0 %v503_v49 }
 0x131   : > { %2206 = vmatpush3.bf16.xpose.msra.mxu1 %v2205_v30  ;;  %2076 = vmatprep.subr.bf16.mxu0 %v2214_v52 }
 0x132   : > { %2207 = vmatprep.subr.bf16.mxu1 %v2543_v9  ;;  %2077 = vmatpush3.bf16.msra.mxu0 %v2214_v52 }
 0x133   : > { %533 = vadd.xlane.f32.xlu1 %v504_v53  ;;  %2078 = vmatprep.subr.bf16.mxu0 %v2217_v50 }
 0x134   : > { %535 = vadd.xlane.f32.xlu0 %v505_v54 }
 0x136   : > { %2079 = vmatpush3.bf16.msra.mxu0 %v2217_v50 }
 0x137   : > { %537 = vadd.xlane.f32.xlu1 %v506_v55 }
 0x139   : > { %2209 = vmatpush3.bf16.xpose.msra.mxu1 %v2208_v42 }
 0x13a   : > { %2210 = vmatprep.subr.bf16.mxu1 %v2543_v9 }
 0x141   : > { %2212 = vmatpush3.bf16.xpose.msra.mxu1 %v2211_v40 }
 0x142   : > { %2213 = vmatprep.subr.bf16.mxu1 %v2543_v9 }
 0x149   : > { %2215 = vmatpush3.bf16.xpose.msra.mxu1 %v2214_v52 }
 0x14a   : > { %2216 = vmatprep.subr.bf16.mxu1 %v2543_v9 }
 0x151   : > { %2218 = vmatpush3.bf16.xpose.msra.mxu1 %v2217_v50 }
 0x152   : > { %2219 = vmatprep.subr.bf16.mxu1 %v2543_v9 }
 0x158   : > { %2062 = vmatmul.mubr.f32.vlgmr.msra.gmra.mrb[0].mxu1 %v2717_v14 }
 0x159   : > { %2160 = vmatprep.mubr.msk.f32.mxu1 %vm2544_vm1, %v2545_v10 }
 0x1a3   : > { %v512_v56 = vpop.xlane.xlu1 %511 }
 0x1a4   : > { %v508_v57 = vpop.xlane.xlu0 %507 }
 0x1a7   : > { %v514_v58 = vpop.xlane.xlu1 %513 }
 0x1a8   : > { %v510_v59 = vpop.xlane.xlu0 %509 }
 0x1ac   : > { %v516_v62 = vpop.xlane.xlu0 %515 }
 0x1af   : > { %v518_v61 = vpop.xlane.xlu1 %517 }
 0x1b0   : > { %v520_v15 = vpop.xlane.xlu0 %519 }
 0x1b3   : > { %v522_v13 = vpop.xlane.xlu1 %521 }
 0x1b4   : > { %v524_v27 = vpop.xlane.xlu0 %523 }
 0x1b8   : > { %v526_v26 = vpop.xlane.xlu1 %525 }
 0x1b9   : > { %v528_v47 = vpop.xlane.xlu0 %527 }
 0x1bc   : > { %v530_v46 = vpop.xlane.xlu1 %529 }
 0x22b   : > { %v605_v63 = vpop.f32.mrb[0].mxu1 }
 0x22c   : > { %v2752_v0 = vrot.slane %v605_v63, %v611_v60  ;;  %v2063_v1 = vpop.f32.mrb[1].mxu1 }
 0x22e   : > { %v613_v6 = vadd.f32 %v2752_v0, %v508_v57  ;;  %v614_v7 = vadd.f32 %v2752_v0, %v510_v59  ;;  %v615_v8 = vadd.f32 %v2752_v0, %v512_v56  ;;  %v616_v10 = vadd.f32 %v2752_v0, %v514_v58  ;;  %v279_v57 = vld [vmem:[%s2687_s28 + $0x58] sm:$0xff]  ;;  %v278_v58 = vld [vmem:[%s2687_s28 + $0x50] sm:$0xff]  ;;  %v534_v59 = vpop.xlane.xlu1 %533 }
 0x22f   : > { %v618_v16 = vadd.f32 %v2752_v0, %v518_v61  ;;  %v617_v17 = vadd.f32 %v2752_v0, %v516_v62  ;;  %v620_v29 = vadd.f32 %v2752_v0, %v522_v13  ;;  %v619_v30 = vadd.f32 %v2752_v0, %v520_v15  ;;  %v532_v61 = vpop.xlane.xlu0 %531 }
 0x230   : > { %v629_v18 = vadd.f32 %v613_v6, %v268_v2  ;;  %v630_v19 = vadd.f32 %v614_v7, %v269_v3  ;;  %v631_v20 = vadd.f32 %v615_v8, %v270_v4  ;;  %v632_v21 = vadd.f32 %v616_v10, %v271_v5  ;;  %v281_v4 = vld [vmem:[%s2687_s28 + $0x68] sm:$0xff]  ;;  %v280_v8 = vld [vmem:[%s2687_s28 + $0x60] sm:$0xff] }
 0x231   : > { %v634_v23 = vadd.f32 %v618_v16, %v273_v11  ;;  %v633_v28 = vadd.f32 %v617_v17, %v272_v22  ;;  %v636_v38 = vadd.f32 %v620_v29, %v275_v35  ;;  %v635_v39 = vadd.f32 %v619_v30, %v274_v36  ;;  %v283_v22 = vld [vmem:[%s2687_s28 + $0x78] sm:$0xff] }
 0x232   : > { %vm645_vm2 = vcmp.gt.f32.partialorder %v629_v18, 0.0  ;;  %v661_v24 = vmul.f32 0.2, %v629_v18  ;;  %vm646_vm3 = vcmp.gt.f32.partialorder %v630_v19, 0.0  ;;  %v662_v25 = vmul.f32 0.2, %v630_v19  ;;  %v538_v11 = vpop.xlane.xlu1 %537 }
 0x233   : > { %v663_v33 = vmul.f32 0.2, %v631_v20  ;;  %v664_v34 = vmul.f32 0.2, %v632_v21  ;;  %vm647_vm4 = vcmp.gt.f32.partialorder %v631_v20, 0.0  ;;  %vm648_vm5 = vcmp.gt.f32.partialorder %v632_v21, 0.0  ;;  %v536_v13 = vpop.xlane.xlu0 %535 }
 0x234   : > { %v2768_v31 = vsel %vm645_vm2, %v629_v18, %v661_v24  ;;  %v2770_v32 = vsel %vm646_vm3, %v630_v19, %v662_v25  ;;  %v666_v37 = vmul.f32 0.2, %v634_v23  ;;  %vm650_vm6 = vcmp.gt.f32.partialorder %v634_v23, 0.0 }
 0x235   : > { %693 = vmax.xlane.f32.xlu0 %v2768_v31  ;;  %695 = vmax.xlane.f32.xlu1 %v2770_v32  ;;  %v622_v40 = vadd.f32 %v2752_v0, %v526_v26  ;;  %v2777_v41 = vsel %vm647_vm4, %v631_v20, %v663_v33  ;;  %v2779_v42 = vsel %vm648_vm5, %v632_v21, %v664_v34  ;;  %v665_v43 = vmul.f32 0.2, %v633_v28 }
 0x236   : > { %v621_v45 = vadd.f32 %v2752_v0, %v524_v27  ;;  %vm649_vm7 = vcmp.gt.f32.partialorder %v633_v28, 0.0  ;;  %v2786_v49 = vsel %vm650_vm6, %v634_v23, %v666_v37  ;;  %v668_v50 = vmul.f32 0.2, %v636_v38  ;;  %v282_v23 = vld [vmem:[%s2687_s28 + $0x70] sm:$0xff] }
 0x237   : > { %v638_v51 = vadd.f32 %v622_v40, %v277_v44  ;;  %v624_v52 = vadd.f32 %v2752_v0, %v530_v46  ;;  %v623_v53 = vadd.f32 %v2752_v0, %v528_v47  ;;  %v2790_v54 = vsel %vm649_vm7, %v633_v28, %v665_v43 }
 0x238   : > { %vm652_vm8 = vcmp.gt.f32.partialorder %v636_v38, 0.0  ;;  %v667_v55 = vmul.f32 0.2, %v635_v39  ;;  %v637_v56 = vadd.f32 %v621_v45, %v276_v48  ;;  %vm651_vm9 = vcmp.gt.f32.partialorder %v635_v39, 0.0 }
 0x239   : > { %697 = vmax.xlane.f32.xlu0 %v2777_v41  ;;  %699 = vmax.xlane.f32.xlu1 %v2779_v42  ;;  %v626_v62 = vadd.f32 %v2752_v0, %v534_v59  ;;  %v2797_v63 = vsel %vm652_vm8, %v636_v38, %v668_v50  ;;  %v670_v1 = vmul.f32 0.2, %v638_v51  ;;  %v640_v2 = vadd.f32 %v624_v52, %v279_v57 }
 0x23a   : > { %v639_v3 = vadd.f32 %v623_v53, %v278_v58  ;;  %v2800_v5 = vsel %vm651_vm9, %v635_v39, %v667_v55  ;;  %vm654_vm10 = vcmp.gt.f32.partialorder %v638_v51, 0.0  ;;  %v669_v6 = vmul.f32 0.2, %v637_v56 }
 0x23b   : > { %v625_v7 = vadd.f32 %v2752_v0, %v532_v61  ;;  %vm653_vm11 = vcmp.gt.f32.partialorder %v637_v56, 0.0  ;;  %v642_v10 = vadd.f32 %v626_v62, %v281_v4  ;;  %v2806_v15 = vsel %vm654_vm10, %v638_v51, %v670_v1 }
 0x23c   : > { %vm656_vm12 = vcmp.gt.f32.partialorder %v640_v2, 0.0  ;;  %v672_v16 = vmul.f32 0.2, %v640_v2  ;;  %v671_v17 = vmul.f32 0.2, %v639_v3  ;;  %v2808_v18 = vsel %vm653_vm11, %v637_v56, %v669_v6 }
 0x23d   : > { %703 = vmax.xlane.f32.xlu1 %v2786_v49  ;;  %701 = vmax.xlane.f32.xlu0 %v2790_v54  ;;  %v641_v19 = vadd.f32 %v625_v7, %v280_v8  ;;  %v628_v20 = vadd.f32 %v2752_v0, %v538_v11  ;;  %v627_v21 = vadd.f32 %v2752_v0, %v536_v13  ;;  %vm655_vm13 = vcmp.gt.f32.partialorder %v639_v3, 0.0 }
 0x23e   : > { %v2816_v24 = vsel %vm656_vm12, %v640_v2, %v672_v16  ;;  %v674_v25 = vmul.f32 0.2, %v642_v10  ;;  %v2818_v26 = vsel %vm655_vm13, %v639_v3, %v671_v17  ;;  %vm658_vm14 = vcmp.gt.f32.partialorder %v642_v10, 0.0 }
 0x23f   : > { %v673_v27 = vmul.f32 0.2, %v641_v19  ;;  %v644_v28 = vadd.f32 %v628_v20, %v283_v22  ;;  %v643_v29 = vadd.f32 %v627_v21, %v282_v23  ;;  %vm657_vm15 = vcmp.gt.f32.partialorder %v641_v19, 0.0 }
 0x240   : > { %v2822_v0 = vsel %vm658_vm14, %v642_v10, %v674_v25 }
 0x241   : > { %707 = vmax.xlane.f32.xlu1 %v2797_v63  ;;  %705 = vmax.xlane.f32.xlu0 %v2800_v5  ;;  %v2824_v30 = vsel %vm657_vm15, %v641_v19, %v673_v27  ;;  %v676_v33 = vmul.f32 0.2, %v644_v28  ;;  %v675_v34 = vmul.f32 0.2, %v643_v29  ;;  %vm660_vm0 = vcmp.gt.f32.partialorder %v644_v28, 0.0 }
 0x242   : > { %vm659_vm1 = vcmp.gt.f32.partialorder %v643_v29, 0.0 }
 0x243   : > { %v2828_v35 = vsel %vm660_vm0, %v644_v28, %v676_v33  ;;  %v2830_v36 = vsel %vm659_vm1, %v643_v29, %v675_v34 }
 0x245   : > { %711 = vmax.xlane.f32.xlu1 %v2806_v15  ;;  %709 = vmax.xlane.f32.xlu0 %v2808_v18 }
 0x249   : > { %715 = vmax.xlane.f32.xlu1 %v2816_v24  ;;  %713 = vmax.xlane.f32.xlu0 %v2818_v26 }
 0x24d   : > { %719 = vmax.xlane.f32.xlu1 %v2822_v0  ;;  %717 = vmax.xlane.f32.xlu0 %v2824_v30 }
 0x251   : > { %723 = vmax.xlane.f32.xlu1 %v2828_v35  ;;  %721 = vmax.xlane.f32.xlu0 %v2830_v36 }
 0x2c2   : > { %v696_v37 = vpop.xlane.xlu1 %695  ;;  %v694_v38 = vpop.xlane.xlu0 %693 }
 0x2c3   : > { %v726_v39 = vsub.f32 %v2770_v32, %v696_v37  ;;  %v725_v40 = vsub.f32 %v2768_v31, %v694_v38 }
 0x2c5   : > { %v743_v43 = vmul.f32 1.442695, %v726_v39  ;;  %v741_v44 = vmul.f32 1.442695, %v725_v40 }
 0x2c6   : > { %v700_v45 = vpop.xlane.xlu1 %699  ;;  %v698_v46 = vpop.xlane.xlu0 %697 }
 0x2c7   : > { %2313 = vpow2.f32 %v743_v43  ;;  %v728_v47 = vsub.f32 %v2779_v42, %v700_v45  ;;  %v727_v48 = vsub.f32 %v2777_v41, %v698_v46 }
 0x2c8   : > { %2315 = vpow2.f32 %v741_v44 }
 0x2c9   : > { %v747_v50 = vmul.f32 1.442695, %v728_v47  ;;  %v745_v51 = vmul.f32 1.442695, %v727_v48 }
 0x2ca   : > { %v704_v52 = vpop.xlane.xlu1 %703  ;;  %v702_v53 = vpop.xlane.xlu0 %701 }
 0x2cb   : > { %2317 = vpow2.f32 %v747_v50  ;;  %v730_v55 = vsub.f32 %v2786_v49, %v704_v52  ;;  %v729_v32 = vsub.f32 %v2790_v54, %v702_v53  ;;  %v2305_v52 = vld [vmem:[%s3123_s3] sm:$0xff]   ;;  %v2306_v53 = vld [vmem:[%s3123_s3 + $0x8] sm:$0xff]  }
 0x2cc   : > { %2319 = vpow2.f32 %v745_v51  ;;  %2096 = vmatprep.subr.bf16.mxu0 %v2305_v52 }
 0x2cd   : > { %v751_v31 = vmul.f32 1.442695, %v730_v55  ;;  %v749_v56 = vmul.f32 1.442695, %v729_v32  ;;  %v2307_v55 = vld [vmem:[%s3123_s3 + $0x10] sm:$0xff]   ;;  %v2308_v32 = vld [vmem:[%s3123_s3 + $0x18] sm:$0xff]  }
 0x2ce   : > { %v708_v57 = vpop.xlane.xlu1 %707  ;;  %v706_v58 = vpop.xlane.xlu0 %705 }
 0x2cf   : > { %2321 = vpow2.f32 %v751_v31  ;;  %v732_v42 = vsub.f32 %v2797_v63, %v708_v57  ;;  %v731_v41 = vsub.f32 %v2800_v5, %v706_v58  ;;  %v2309_v31 = vld [vmem:[%s3123_s3 + $0x20] sm:$0xff]   ;;  %v2311_v57 = vld [vmem:[%s3123_s3 + $0x30] sm:$0xff]   ;;  %v2312_v58 = vld [vmem:[%s3123_s3 + $0x38] sm:$0xff]  }
 0x2d0   : > { %2323 = vpow2.f32 %v749_v56  ;;  %v2310_v56 = vld [vmem:[%s3123_s3 + $0x28] sm:$0xff]  }
 0x2d1   : > { %v2314_v59 = vpop.eup %2313  ;;  %v755_v61 = vmul.f32 1.442695, %v732_v42  ;;  %v753_v62 = vmul.f32 1.442695, %v731_v41 }
 0x2d2   : > { %v2316_v1 = vpop.eup %2315  ;;  %775 = vadd.xlane.f32.xlu1 %v2314_v59  ;;  %v712_v2 = vpop.xlane.xlu1 %711 }
 0x2d3   : > { %v710_v49 = vpop.xlane.xlu0 %709  ;;  %2325 = vpow2.f32 %v755_v61  ;;  %v734_v54 = vsub.f32 %v2806_v15, %v712_v2  ;;  %773 = vadd.xlane.f32.xlu0 %v2316_v1  ;;  %v805_v4 = vpack.c.bf16 %v2314_v59, %v2316_v1 }
 0x2d4   : > { %v733_v3 = vsub.f32 %v2808_v18, %v710_v49  ;;  %2327 = vpow2.f32 %v753_v62 }
 0x2d5   : > { %v2318_v6 = vpop.eup %2317  ;;  %v759_v63 = vmul.f32 1.442695, %v734_v54  ;;  %2080 = vmatprep.mubr.bf16.mxu0 %v805_v4  ;;  %v952_v4 = vsub.s32 2, %v2711_v12 }
 0x2d6   : > { %v757_v7 = vmul.f32 1.442695, %v733_v3  ;;  %v2320_v5 = vpop.eup %2319  ;;  %779 = vadd.xlane.f32.xlu1 %v2318_v6  ;;  %v716_v8 = vpop.xlane.xlu1 %715 }
 0x2d7   : > { %v714_v10 = vpop.xlane.xlu0 %713  ;;  %2329 = vpow2.f32 %v759_v63  ;;  %v736_v11 = vsub.f32 %v2816_v24, %v716_v8  ;;  %777 = vadd.xlane.f32.xlu0 %v2320_v5  ;;  %v806_v15 = vpack.c.bf16 %v2318_v6, %v2320_v5 }
 0x2d8   : > { %v735_v13 = vsub.f32 %v2818_v26, %v714_v10  ;;  %2331 = vpow2.f32 %v757_v7 }
 0x2d9   : > { %v2322_v16 = vpop.eup %2321  ;;  %v763_v17 = vmul.f32 1.442695, %v736_v11  ;;  %2081 = vmatmul.mubr.bf16.vlgmr.msra.gmra.mrb[16].mxu0 %v806_v15  ;;  %v2876_v11 = vrot.slane %v2717_v14, %v952_v4 }
 0x2da   : > { %v761_v18 = vmul.f32 1.442695, %v735_v13  ;;  %v2324_v19 = vpop.eup %2323  ;;  %783 = vadd.xlane.f32.xlu1 %v2322_v16  ;;  %v720_v20 = vpop.xlane.xlu1 %719  ;;  %2097 = vmatpush3.bf16.msra.mxu0 %v2305_v52 }
 0x2db   : > { %v718_v21 = vpop.xlane.xlu0 %717  ;;  %2333 = vpow2.f32 %v763_v17  ;;  %v738_v22 = vsub.f32 %v2822_v0, %v720_v20  ;;  %781 = vadd.xlane.f32.xlu0 %v2324_v19  ;;  %v807_v24 = vpack.c.bf16 %v2322_v16, %v2324_v19  ;;  %2098 = vmatprep.subr.bf16.mxu0 %v2306_v53 }
 0x2dc   : > { %v737_v23 = vsub.f32 %v2824_v30, %v718_v21  ;;  %2335 = vpow2.f32 %v761_v18 }
 0x2dd   : > { %v2326_v25 = vpop.eup %2325  ;;  %v767_v26 = vmul.f32 1.442695, %v738_v22  ;;  %2084 = vmatprep.mubr.bf16.mxu0 %v807_v24 }
 0x2de   : > { %v765_v27 = vmul.f32 1.442695, %v737_v23  ;;  %v2328_v28 = vpop.eup %2327  ;;  %787 = vadd.xlane.f32.xlu1 %v2326_v25  ;;  %v724_v29 = vpop.xlane.xlu1 %723  ;;  %2099 = vmatpush3.bf16.msra.mxu0 %v2306_v53 }
 0x2df   : > { %v722_v33 = vpop.xlane.xlu0 %721  ;;  %2337 = vpow2.f32 %v767_v26  ;;  %v740_v34 = vsub.f32 %v2828_v35, %v724_v29  ;;  %785 = vadd.xlane.f32.xlu0 %v2328_v28  ;;  %v808_v0 = vpack.c.bf16 %v2326_v25, %v2328_v28  ;;  %2100 = vmatprep.subr.bf16.mxu0 %v2307_v55 }
 0x2e0   : > { %v739_v37 = vsub.f32 %v2830_v36, %v722_v33  ;;  %2339 = vpow2.f32 %v765_v27 }
 0x2e1   : > { %v2330_v38 = vpop.eup %2329  ;;  %v771_v30 = vmul.f32 1.442695, %v740_v34  ;;  %2085 = vmatmul.mubr.bf16.gmra.mrb[20].mxu0 %v808_v0 }
 0x2e2   : > { %v769_v39 = vmul.f32 1.442695, %v739_v37  ;;  %v2332_v40 = vpop.eup %2331  ;;  %791 = vadd.xlane.f32.xlu1 %v2330_v38  ;;  %2101 = vmatpush3.bf16.msra.mxu0 %v2307_v55 }
 0x2e3   : > { %2341 = vpow2.f32 %v771_v30  ;;  %789 = vadd.xlane.f32.xlu0 %v2332_v40  ;;  %v809_v43 = vpack.c.bf16 %v2330_v38, %v2332_v40  ;;  %2102 = vmatprep.subr.bf16.mxu0 %v2308_v32 }
 0x2e4   : > { %2343 = vpow2.f32 %v769_v39 }
 0x2e5   : > { %v2334_v44 = vpop.eup %2333  ;;  %2088 = vmatprep.mubr.bf16.mxu0 %v809_v43 }
 0x2e6   : > { %v2336_v45 = vpop.eup %2335  ;;  %795 = vadd.xlane.f32.xlu1 %v2334_v44  ;;  %2103 = vmatpush3.bf16.msra.mxu0 %v2308_v32 }
 0x2e7   : > { %793 = vadd.xlane.f32.xlu0 %v2336_v45  ;;  %v810_v35 = vpack.c.bf16 %v2334_v44, %v2336_v45  ;;  %2104 = vmatprep.subr.bf16.mxu0 %v2309_v31 }
 0x2e9   : > { %v2338_v46 = vpop.eup %2337  ;;  %2089 = vmatmul.mubr.bf16.gmra.mrb[24].mxu0 %v810_v35 }
 0x2ea   : > { %v2340_v36 = vpop.eup %2339  ;;  %799 = vadd.xlane.f32.xlu1 %v2338_v46  ;;  %2105 = vmatpush3.bf16.msra.mxu0 %v2309_v31 }
 0x2eb   : > { %797 = vadd.xlane.f32.xlu0 %v2340_v36  ;;  %v811_v47 = vpack.c.bf16 %v2338_v46, %v2340_v36  ;;  %2106 = vmatprep.subr.bf16.mxu0 %v2310_v56 }
 0x2ed   : > { %v2342_v48 = vpop.eup %2341  ;;  %2092 = vmatprep.mubr.bf16.mxu0 %v811_v47 }
 0x2ee   : > { %v2344_v50 = vpop.eup %2343  ;;  %803 = vadd.xlane.f32.xlu1 %v2342_v48  ;;  %2107 = vmatpush3.bf16.msra.mxu0 %v2310_v56 }
 0x2ef   : > { %801 = vadd.xlane.f32.xlu0 %v2344_v50  ;;  %v812_v51 = vpack.c.bf16 %v2342_v48, %v2344_v50  ;;  %2108 = vmatprep.subr.bf16.mxu0 %v2311_v57 }
 0x2f1   : > { %2093 = vmatmul.mubr.bf16.gmra.mrb[28].mxu0 %v812_v51 }
 0x2f2   : > { %2109 = vmatpush3.bf16.msra.mxu0 %v2311_v57 }
 0x2f3   : > { %2110 = vmatprep.subr.bf16.mxu0 %v2312_v58 }
 0x2f6   : > { %2111 = vmatpush3.bf16.msra.mxu0 %v2312_v58 }
 0x35f   : > { %v776_v41 = vpop.xlane.xlu1 %775 }
 0x360   : > { %v774_v42 = vpop.xlane.xlu0 %773 }
 0x363   : > { %v780_v61 = vpop.xlane.xlu1 %779 }
 0x364   : > { %v778_v59 = vpop.xlane.xlu0 %777 }
 0x365   : > { %2345 = vrcp.f32 %v778_v59 }
 0x366   : > { %2347 = vrcp.f32 %v774_v42 }
 0x367   : > { %v784_v1 = vpop.xlane.xlu1 %783  ;;  %2349 = vrcp.f32 %v780_v61 }
 0x368   : > { %v782_v62 = vpop.xlane.xlu0 %781  ;;  %2351 = vrcp.f32 %v776_v41 }
 0x36b   : > { %v788_v49 = vpop.xlane.xlu1 %787 }
 0x36c   : > { %v786_v2 = vpop.xlane.xlu0 %785 }
 0x36d   : > { %2353 = vrcp.f32 %v786_v2 }
 0x36e   : > { %2355 = vrcp.f32 %v782_v62 }
 0x36f   : > { %v792_v3 = vpop.xlane.xlu1 %791  ;;  %v2346_v63 = vpop.eup %2345  ;;  %2357 = vrcp.f32 %v788_v49 }
 0x370   : > { %v790_v54 = vpop.xlane.xlu0 %789  ;;  %v2348_v5 = vpop.eup %2347  ;;  %2359 = vrcp.f32 %v784_v1 }
 0x371   : > { %v2350_v15 = vpop.eup %2349 }
 0x372   : > { %v2352_v18 = vpop.eup %2351 }
 0x373   : > { %v796_v8 = vpop.xlane.xlu1 %795 }
 0x374   : > { %v794_v6 = vpop.xlane.xlu0 %793 }
 0x375   : > { %2361 = vrcp.f32 %v794_v6 }
 0x376   : > { %2363 = vrcp.f32 %v790_v54 }
 0x377   : > { %v800_v27 = vpop.xlane.xlu1 %799  ;;  %v2354_v29 = vpop.eup %2353  ;;  %2365 = vrcp.f32 %v796_v8 }
 0x378   : > { %v798_v22 = vpop.xlane.xlu0 %797  ;;  %v2356_v37 = vpop.eup %2355  ;;  %2367 = vrcp.f32 %v792_v3 }
 0x379   : > { %v2358_v30 = vpop.eup %2357 }
 0x37a   : > { %v2360_v43 = vpop.eup %2359 }
 0x37b   : > { %v804_v36 = vpop.xlane.xlu1 %803 }
 0x37c   : > { %v802_v44 = vpop.xlane.xlu0 %801 }
 0x37d   : > { %2369 = vrcp.f32 %v802_v44 }
 0x37e   : > { %2371 = vrcp.f32 %v798_v22 }
 0x37f   : > { %v2362_v53 = vpop.eup %2361  ;;  %2373 = vrcp.f32 %v804_v36 }
 0x380   : > { %v2364_v31 = vpop.eup %2363  ;;  %2375 = vrcp.f32 %v800_v27  ;;  %v1141_v27 = vsub.s32 4, %v2711_v12 }
 0x381   : > { %v2366_v58 = vpop.eup %2365 }
 0x382   : > { %v2368_v59 = vpop.eup %2367 }
 0x387   : > { %v2370_v6 = vpop.eup %2369 }
 0x3ac   : > { %v2082_v7 = vpop.f32.mrb[16].mxu0 }
 0x3ad   : > { %v936_v10 = vmul.f32 %v2346_v63, %v2082_v7  ;;  %v855_v13 = vpop.f32.mrb[17].mxu0 }
 0x3ae   : > { %v934_v16 = vmul.f32 %v2348_v5, %v855_v13  ;;  %v2083_v17 = vpop.f32.mrb[18].mxu0  ;;  %v2372_v5 = vpop.eup %2371 }
 0x3af   : > { %v937_v19 = vmul.f32 %v2350_v15, %v2083_v17  ;;  %v858_v20 = vpop.f32.mrb[19].mxu0  ;;  %v956_v23 = vadd.f32 %v2876_v11, %v936_v10  ;;  %v2374_v13 = vpop.eup %2373 }
 0x3b0   : > { %v935_v21 = vmul.f32 %v2352_v18, %v858_v20  ;;  %v954_v25 = vadd.f32 %v2876_v11, %v934_v16  ;;  %v2376_v17 = vpop.eup %2375 }
 0x3b1   : > { %v957_v24 = vadd.f32 %v2876_v11, %v937_v19 }
 0x3b2   : > { %v955_v26 = vadd.f32 %v2876_v11, %v935_v21 }
 0x3b3   : > { %v971_v28 = vpack.c.bf16 %v957_v24, %v956_v23 }
 0x3b4   : > { %v2086_v33 = vpop.f32.mrb[20].mxu0  ;;  %v970_v34 = vpack.c.bf16 %v955_v26, %v954_v25 }
 0x3b5   : > { %v940_v0 = vmul.f32 %v2354_v29, %v2086_v33  ;;  %v871_v38 = vpop.f32.mrb[21].mxu0 }
 0x3b6   : > { %v938_v39 = vmul.f32 %v2356_v37, %v871_v38  ;;  %v2087_v40 = vpop.f32.mrb[22].mxu0  ;;  %2112 = vmatprep.mubr.bf16.mxu0 %v970_v34 }
 0x3b7   : > { %v941_v45 = vmul.f32 %v2358_v30, %v2087_v40  ;;  %v874_v35 = vpop.f32.mrb[23].mxu0  ;;  %2113 = vmatmul.mubr.bf16.vlgmr.msra.gmra.mrb[32].mxu0 %v971_v28  ;;  %v960_v47 = vadd.f32 %v2876_v11, %v940_v0  ;;  %v2896_v28 = vrot.slane %v2717_v14, %v1141_v27 }
 0x3b8   : > { %v939_v46 = vmul.f32 %v2360_v43, %v874_v35  ;;  %v958_v50 = vadd.f32 %v2876_v11, %v938_v39 }
 0x3b9   : > { %v961_v48 = vadd.f32 %v2876_v11, %v941_v45 }
 0x3ba   : > { %v959_v51 = vadd.f32 %v2876_v11, %v939_v46 }
 0x3bb   : > { %v973_v52 = vpack.c.bf16 %v961_v48, %v960_v47 }
 0x3bc   : > { %v2090_v55 = vpop.f32.mrb[24].mxu0  ;;  %v972_v32 = vpack.c.bf16 %v959_v51, %v958_v50 }
 0x3bd   : > { %v944_v56 = vmul.f32 %v2362_v53, %v2090_v55  ;;  %v887_v57 = vpop.f32.mrb[25].mxu0 }
 0x3be   : > { %v942_v42 = vmul.f32 %v2364_v31, %v887_v57  ;;  %v2091_v41 = vpop.f32.mrb[26].mxu0  ;;  %2116 = vmatprep.mubr.bf16.mxu0 %v972_v32 }
 0x3bf   : > { %v945_v61 = vmul.f32 %v2366_v58, %v2091_v41  ;;  %v890_v62 = vpop.f32.mrb[27].mxu0  ;;  %2117 = vmatmul.mubr.bf16.gmra.mrb[36].mxu0 %v973_v52  ;;  %v964_v2 = vadd.f32 %v2876_v11, %v944_v56 }
 0x3c0   : > { %v943_v1 = vmul.f32 %v2368_v59, %v890_v62  ;;  %v962_v54 = vadd.f32 %v2876_v11, %v942_v42 }
 0x3c1   : > { %v965_v49 = vadd.f32 %v2876_v11, %v945_v61 }
 0x3c2   : > { %v963_v3 = vadd.f32 %v2876_v11, %v943_v1 }
 0x3c3   : > { %v975_v4 = vpack.c.bf16 %v965_v49, %v964_v2 }
 0x3c4   : > { %v2094_v63 = vpop.f32.mrb[28].mxu0  ;;  %v974_v7 = vpack.c.bf16 %v963_v3, %v962_v54 }
 0x3c5   : > { %v948_v8 = vmul.f32 %v2370_v6, %v2094_v63  ;;  %v903_v10 = vpop.f32.mrb[29].mxu0  ;;  %v2924_v6 = vld [vmem:[%s3124_s4] sm:$0xff] }
 0x3c6   : > { %v946_v15 = vmul.f32 %v2372_v5, %v903_v10  ;;  %v2095_v16 = vpop.f32.mrb[30].mxu0  ;;  %2120 = vmatprep.mubr.bf16.mxu0 %v974_v7  ;;  %v1192_v63 = vrot.slane %v2924_v6, 3 }
 0x3c7   : > { %v949_v18 = vmul.f32 %v2374_v13, %v2095_v16  ;;  %v906_v19 = vpop.f32.mrb[31].mxu0  ;;  %2121 = vmatmul.mubr.bf16.gmra.mrb[40].mxu0 %v975_v4  ;;  %v968_v21 = vadd.f32 %v2876_v11, %v948_v8 }
 0x3c8   : > { %v947_v20 = vmul.f32 %v2376_v17, %v906_v19  ;;  %v966_v23 = vadd.f32 %v2876_v11, %v946_v15 }
 0x3c9   : > { %v969_v22 = vadd.f32 %v2876_v11, %v949_v18 }
 0x3ca   : > { %v967_v24 = vadd.f32 %v2876_v11, %v947_v20  ;;  %v1873_v20 = vld [vmem:[%s2687_s28 + $0x88] sm:$0xff] }
 0x3cb   : > { %v977_v25 = vpack.c.bf16 %v969_v22, %v968_v21  ;;  %v1872_v21 = vld [vmem:[%s2687_s28 + $0x80] sm:$0xff]  ;;  %v1875_v22 = vld [vmem:[%s2687_s28 + $0x98] sm:$0xff] }
 0x3cc   : > { %v976_v26 = vpack.c.bf16 %v967_v24, %v966_v23  ;;  %v1874_v23 = vld [vmem:[%s2687_s28 + $0x90] sm:$0xff] }
 0x3ce   : > { %2124 = vmatprep.mubr.bf16.mxu0 %v976_v26 }
 0x3cf   : > { %2125 = vmatmul.mubr.bf16.gmra.mrb[44].mxu0 %v977_v25 }
 0x48a   : > { %v2114_v29 = vpop.f32.mrb[32].mxu0 }
 0x48b   : > { %v1076_v33 = vpop.f32.mrb[33].mxu0  ;;  %v1145_v39 = vmul.f32 %v2114_v29, %v2896_v28 }
 0x48c   : > { %v2115_v34 = vpop.f32.mrb[34].mxu0  ;;  %v1143_v37 = vmul.f32 %v2896_v28, %v1076_v33 }
 0x48d   : > { %v2223_v0 = vpack.c.bf16 %v2115_v34, %v2114_v29  ;;  %v1079_v38 = vpop.f32.mrb[35].mxu0  ;;  %v1146_v43 = vmul.f32 %v2115_v34, %v2896_v28 }
 0x48e   : > { %v2220_v30 = vpack.c.bf16 %v1079_v38, %v1076_v33  ;;  %1159 = vadd.xlane.f32.xlu0 %v1143_v37  ;;  %v1144_v11 = vmul.f32 %v2896_v28, %v1079_v38  ;;  %v1876_v38 = vld [vmem:[%s2687_s28 + $0xa0] sm:$0xff] }
 0x490   : > { %2221 = vmatpush3.bf16.xpose.msra.mxu1 %v2220_v30  ;;  %2163 = vmatprep.subr.bf16.mxu0 %v2220_v30 }
 0x491   : > { %1161 = vadd.xlane.f32.xlu1 %v1144_v11  ;;  %2164 = vmatpush3.bf16.msra.mxu0 %v2220_v30 }
 0x492   : > { %1163 = vadd.xlane.f32.xlu0 %v1145_v39  ;;  %v2118_v14 = vpop.f32.mrb[36].mxu0  ;;  %2165 = vmatprep.subr.bf16.mxu0 %v2223_v0 }
 0x493   : > { %v1092_v40 = vpop.f32.mrb[37].mxu0  ;;  %2222 = vmatprep.subr.bf16.mxu1 %v2543_v9  ;;  %v1149_v48 = vmul.f32 %v2118_v14, %v2896_v28 }
 0x494   : > { %v2119_v44 = vpop.f32.mrb[38].mxu0  ;;  %v1147_v45 = vmul.f32 %v2896_v28, %v1092_v40 }
 0x495   : > { %1165 = vadd.xlane.f32.xlu1 %v1146_v43  ;;  %v2229_v35 = vpack.c.bf16 %v2119_v44, %v2118_v14  ;;  %v1095_v46 = vpop.f32.mrb[39].mxu0  ;;  %2166 = vmatpush3.bf16.msra.mxu0 %v2223_v0  ;;  %v1150_v52 = vmul.f32 %v2119_v44, %v2896_v28 }
 0x496   : > { %v2226_v36 = vpack.c.bf16 %v1095_v46, %v1092_v40  ;;  %1167 = vadd.xlane.f32.xlu0 %v1147_v45  ;;  %v1148_v47 = vmul.f32 %v2896_v28, %v1095_v46 }
 0x498   : > { %2224 = vmatpush3.bf16.xpose.msra.mxu1 %v2223_v0  ;;  %2167 = vmatprep.subr.bf16.mxu0 %v2226_v36 }
 0x499   : > { %1169 = vadd.xlane.f32.xlu1 %v1148_v47  ;;  %2168 = vmatpush3.bf16.msra.mxu0 %v2226_v36 }
 0x49a   : > { %1171 = vadd.xlane.f32.xlu0 %v1149_v48  ;;  %v2122_v50 = vpop.f32.mrb[40].mxu0  ;;  %2169 = vmatprep.subr.bf16.mxu0 %v2229_v35  ;;  %v1879_v48 = vld [vmem:[%s2687_s28 + $0xb8] sm:$0xff] }
 0x49b   : > { %v1108_v51 = vpop.f32.mrb[41].mxu0  ;;  %2225 = vmatprep.subr.bf16.mxu1 %v2543_v9  ;;  %v1153_v58 = vmul.f32 %v2122_v50, %v2896_v28 }
 0x49c   : > { %v2123_v53 = vpop.f32.mrb[42].mxu0  ;;  %v1151_v55 = vmul.f32 %v2896_v28, %v1108_v51 }
 0x49d   : > { %1173 = vadd.xlane.f32.xlu1 %v1150_v52  ;;  %v2235_v32 = vpack.c.bf16 %v2123_v53, %v2122_v50  ;;  %v1111_v31 = vpop.f32.mrb[43].mxu0  ;;  %2170 = vmatpush3.bf16.msra.mxu0 %v2229_v35  ;;  %v1154_v59 = vmul.f32 %v2123_v53, %v2896_v28  ;;  %v1878_v50 = vld [vmem:[%s2687_s28 + $0xb0] sm:$0xff] }
 0x49e   : > { %v2232_v56 = vpack.c.bf16 %v1111_v31, %v1108_v51  ;;  %1175 = vadd.xlane.f32.xlu0 %v1151_v55  ;;  %v1152_v57 = vmul.f32 %v2896_v28, %v1111_v31 }
 0x4a0   : > { %2227 = vmatpush3.bf16.xpose.msra.mxu1 %v2226_v36  ;;  %2171 = vmatprep.subr.bf16.mxu0 %v2232_v56 }
 0x4a1   : > { %1177 = vadd.xlane.f32.xlu1 %v1152_v57  ;;  %2172 = vmatpush3.bf16.msra.mxu0 %v2232_v56 }
 0x4a2   : > { %1179 = vadd.xlane.f32.xlu0 %v1153_v58  ;;  %v2126_v42 = vpop.f32.mrb[44].mxu0  ;;  %2173 = vmatprep.subr.bf16.mxu0 %v2235_v32 }
 0x4a3   : > { %v1124_v41 = vpop.f32.mrb[45].mxu0  ;;  %2228 = vmatprep.subr.bf16.mxu1 %v2543_v9  ;;  %v1157_v3 = vmul.f32 %v2126_v42, %v2896_v28 }
 0x4a4   : > { %v2127_v61 = vpop.f32.mrb[46].mxu0  ;;  %v1155_v62 = vmul.f32 %v2896_v28, %v1124_v41 }
 0x4a5   : > { %1181 = vadd.xlane.f32.xlu1 %v1154_v59  ;;  %v2241_v1 = vpack.c.bf16 %v2127_v61, %v2126_v42  ;;  %v1127_v2 = vpop.f32.mrb[47].mxu0  ;;  %2174 = vmatpush3.bf16.msra.mxu0 %v2235_v32  ;;  %v1158_v4 = vmul.f32 %v2127_v61, %v2896_v28  ;;  %v1881_v42 = vld [vmem:[%s2687_s28 + $0xc8] sm:$0xff]  ;;  %v1880_v59 = vld [vmem:[%s2687_s28 + $0xc0] sm:$0xff] }
 0x4a6   : > { %v2238_v49 = vpack.c.bf16 %v1127_v2, %v1124_v41  ;;  %1183 = vadd.xlane.f32.xlu0 %v1155_v62  ;;  %v1156_v54 = vmul.f32 %v2896_v28, %v1127_v2  ;;  %v1877_v28 = vld [vmem:[%s2687_s28 + $0xa8] sm:$0xff] }
 0x4a8   : > { %2230 = vmatpush3.bf16.xpose.msra.mxu1 %v2229_v35  ;;  %2175 = vmatprep.subr.bf16.mxu0 %v2238_v49 }
 0x4a9   : > { %1185 = vadd.xlane.f32.xlu1 %v1156_v54  ;;  %2176 = vmatpush3.bf16.msra.mxu0 %v2238_v49 }
 0x4aa   : > { %1187 = vadd.xlane.f32.xlu0 %v1157_v3  ;;  %2177 = vmatprep.subr.bf16.mxu0 %v2241_v1 }
 0x4ab   : > { %2231 = vmatprep.subr.bf16.mxu1 %v2543_v9 }
 0x4ad   : > { %1189 = vadd.xlane.f32.xlu1 %v1158_v4  ;;  %2178 = vmatpush3.bf16.msra.mxu0 %v2241_v1 }
 0x4b0   : > { %2233 = vmatpush3.bf16.xpose.msra.mxu1 %v2232_v56 }
 0x4b1   : > { %2234 = vmatprep.subr.bf16.mxu1 %v2543_v9 }
 0x4b8   : > { %2236 = vmatpush3.bf16.xpose.msra.mxu1 %v2235_v32 }
 0x4b9   : > { %2237 = vmatprep.subr.bf16.mxu1 %v2543_v9 }
 0x4c0   : > { %2239 = vmatpush3.bf16.xpose.msra.mxu1 %v2238_v49 }
 0x4c1   : > { %2240 = vmatprep.subr.bf16.mxu1 %v2543_v9 }
 0x4c8   : > { %2242 = vmatpush3.bf16.xpose.msra.mxu1 %v2241_v1 }
 0x4cf   : > { %2161 = vmatmul.mubr.f32.vlgmr.msra.gmra.mrb[2].mxu1 %v1192_v63  ;;  %v1883_v63 = vld [vmem:[%s2687_s28 + $0xd8] sm:$0xff] }
 0x51b   : > { %v1160_v7 = vpop.xlane.xlu0 %1159 }
 0x51e   : > { %v1162_v5 = vpop.xlane.xlu1 %1161 }
 0x51f   : > { %v1164_v8 = vpop.xlane.xlu0 %1163 }
 0x522   : > { %v1166_v10 = vpop.xlane.xlu1 %1165 }
 0x523   : > { %v1168_v13 = vpop.xlane.xlu0 %1167 }
 0x526   : > { %v1170_v9 = vpop.xlane.xlu1 %1169 }
 0x527   : > { %v1172_v15 = vpop.xlane.xlu0 %1171 }
 0x52a   : > { %v1174_v16 = vpop.xlane.xlu1 %1173 }
 0x52b   : > { %v1176_v30 = vpop.xlane.xlu0 %1175 }
 0x52e   : > { %v1178_v11 = vpop.xlane.xlu1 %1177 }
 0x52f   : > { %v1180_v52 = vpop.xlane.xlu0 %1179 }
 0x532   : > { %v1182_v53 = vpop.xlane.xlu1 %1181 }
 0x5a2   : > { %v1260_v17 = vpop.f32.mrb[2].mxu1 }
 0x5a3   : > { %v2929_v18 = vrot.slane %v1260_v17, %v611_v60  ;;  %v2162_v19 = vpop.f32.mrb[3].mxu1  ;;  %v1885_v17 = vld [vmem:[%s2687_s28 + $0xe8] sm:$0xff] }
 0x5a5   : > { %v1269_v24 = vadd.f32 %v2929_v18, %v1162_v5  ;;  %v1268_v25 = vadd.f32 %v2929_v18, %v1160_v7  ;;  %v1271_v26 = vadd.f32 %v2929_v18, %v1166_v10  ;;  %v1270_v27 = vadd.f32 %v2929_v18, %v1164_v8  ;;  %v1882_v7 = vld [vmem:[%s2687_s28 + $0xd0] sm:$0xff]  ;;  %v1184_v5 = vpop.xlane.xlu0 %1183  ;;  %v1186_v8 = vpop.xlane.xlu1 %1185 }
 0x5a6   : > { %v1273_v29 = vadd.f32 %v2929_v18, %v1170_v9  ;;  %v1272_v60 = vadd.f32 %v2929_v18, %v1168_v13  ;;  %v1275_v44 = vadd.f32 %v2929_v18, %v1174_v16  ;;  %v1274_v45 = vadd.f32 %v2929_v18, %v1172_v15 }
 0x5a7   : > { %v1285_v33 = vadd.f32 %v1873_v20, %v1269_v24  ;;  %v1284_v34 = vadd.f32 %v1872_v21, %v1268_v25  ;;  %v1287_v37 = vadd.f32 %v1875_v22, %v1271_v26  ;;  %v1286_v0 = vadd.f32 %v1874_v23, %v1270_v27  ;;  %v1884_v22 = vld [vmem:[%s2687_s28 + $0xe0] sm:$0xff] }
 0x5a8   : > { %v1289_v39 = vadd.f32 %v1877_v28, %v1273_v29  ;;  %v1288_v43 = vadd.f32 %v1876_v38, %v1272_v60  ;;  %v1291_v55 = vadd.f32 %v1879_v48, %v1275_v44  ;;  %v1290_v32 = vadd.f32 %v1878_v50, %v1274_v45 }
 0x5a9   : > { %vm1301_vm2 = vcmp.gt.f32.partialorder %v1285_v33, 0.0  ;;  %v1317_v14 = vmul.f32 0.2, %v1285_v33  ;;  %vm1300_vm3 = vcmp.gt.f32.partialorder %v1284_v34, 0.0  ;;  %v1316_v40 = vmul.f32 0.2, %v1284_v34  ;;  %v1188_v24 = vpop.xlane.xlu0 %1187  ;;  %v1190_v25 = vpop.xlane.xlu1 %1189 }
 0x5aa   : > { %v1319_v36 = vmul.f32 0.2, %v1287_v37  ;;  %v1318_v47 = vmul.f32 0.2, %v1286_v0  ;;  %vm1303_vm4 = vcmp.gt.f32.partialorder %v1287_v37, 0.0  ;;  %vm1302_vm5 = vcmp.gt.f32.partialorder %v1286_v0, 0.0 }
 0x5ab   : > { %v2945_v35 = vsel %vm1301_vm2, %v1285_v33, %v1317_v14  ;;  %v2947_v46 = vsel %vm1300_vm3, %v1284_v34, %v1316_v40  ;;  %v1321_v51 = vmul.f32 0.2, %v1289_v39  ;;  %vm1305_vm6 = vcmp.gt.f32.partialorder %v1289_v39, 0.0 }
 0x5ac   : > { %1350 = vmax.xlane.f32.xlu1 %v2945_v35  ;;  %1348 = vmax.xlane.f32.xlu0 %v2947_v46  ;;  %v1277_v31 = vadd.f32 %v2929_v18, %v1178_v11  ;;  %v2954_v56 = vsel %vm1303_vm4, %v1287_v37, %v1319_v36  ;;  %v2956_v57 = vsel %vm1302_vm5, %v1286_v0, %v1318_v47  ;;  %v1320_v58 = vmul.f32 0.2, %v1288_v43  ;;  %v1887_v37 = vld [vmem:[%s2687_s28 + $0xf8] sm:$0xff]  ;;  %v1886_v0 = vld [vmem:[%s2687_s28 + $0xf0] sm:$0xff]  ;;  %s1869_s28 = sshll.u32 %s2683_s23, 4 }
 0x5ad   : > { %v1276_v41 = vadd.f32 %v2929_v18, %v1176_v30  ;;  %vm1304_vm7 = vcmp.gt.f32.partialorder %v1288_v43, 0.0  ;;  %v2963_v61 = vsel %vm1305_vm6, %v1289_v39, %v1321_v51  ;;  %v1323_v62 = vmul.f32 0.2, %v1291_v55  ;;  %s3056_s26 = scalar_lea.vmem [#allocation5], %s1869_s28 }
 0x5ae   : > { %v1293_v1 = vadd.f32 %v1881_v42, %v1277_v31  ;;  %v1279_v2 = vadd.f32 %v2929_v18, %v1182_v53  ;;  %v1278_v49 = vadd.f32 %v2929_v18, %v1180_v52  ;;  %v2967_v54 = vsel %vm1304_vm7, %v1288_v43, %v1320_v58  ;;  %s1776_s14 = sshll.u32 %s3056_s26, 4  ;;  %s3073_s14 = int_to_ptr.vmem [resolvable:$true] %s1776_s14 }
 0x5af   : > { %vm1307_vm8 = vcmp.gt.f32.partialorder %v1291_v55, 0.0  ;;  %v1322_v3 = vmul.f32 0.2, %v1290_v32  ;;  %v1292_v4 = vadd.f32 %v1880_v59, %v1276_v41  ;;  %vm1306_vm9 = vcmp.gt.f32.partialorder %v1290_v32, 0.0  ;;  %s2472_s7 = scalar_lea.vmem %s3073_s14, 256  ;;  %p2479_p10 = scmp.lt.s32.totalorder %s3073_s14, %s2477_s29 }
 0x5b0   : > { %1354 = vmax.xlane.f32.xlu1 %v2954_v56  ;;  %1352 = vmax.xlane.f32.xlu0 %v2956_v57  ;;  %v1281_v10 = vadd.f32 %v2929_v18, %v1186_v8  ;;  %v2974_v13 = vsel %vm1307_vm8, %v1291_v55, %v1323_v62  ;;  %v1325_v9 = vmul.f32 0.2, %v1293_v1  ;;  %v1295_v15 = vadd.f32 %v1883_v63, %v1279_v2  ;;  %p2473_p6 = scmp.ne.s32.totalorder %s3073_s14, %s2472_s7  ;;  %p2480_p0 = scmp.lt.s32.totalorder %s2478_s10, %s2472_s7 }
 0x5b1   : > { %v1294_v16 = vadd.f32 %v1882_v7, %v1278_v49  ;;  %v2977_v19 = vsel %vm1306_vm9, %v1290_v32, %v1322_v3  ;;  %vm1309_vm10 = vcmp.gt.f32.partialorder %v1293_v1, 0.0  ;;  %v1324_v20 = vmul.f32 0.2, %v1292_v4 }
 0x5b2   : > { %v1280_v21 = vadd.f32 %v2929_v18, %v1184_v5  ;;  %vm1308_vm11 = vcmp.gt.f32.partialorder %v1292_v4, 0.0  ;;  %v1297_v23 = vadd.f32 %v1885_v17, %v1281_v10  ;;  %v2983_v26 = vsel %vm1309_vm10, %v1293_v1, %v1325_v9  ;;  %p2474_p13 = pnand %p2473_p6, %p3132_p12  ;;  %p2481_p2 = por %p2480_p0, %p2479_p10 }
 0x5b3   : > { %vm1311_vm12 = vcmp.gt.f32.partialorder %v1295_v15, 0.0  ;;  %v1327_v27 = vmul.f32 0.2, %v1295_v15  ;;  %v1326_v28 = vmul.f32 0.2, %v1294_v16  ;;  %v2985_v29 = vsel %vm1308_vm11, %v1292_v4, %v1324_v20 }
 0x5b4   : > { %1358 = vmax.xlane.f32.xlu1 %v2963_v61  ;;  %1356 = vmax.xlane.f32.xlu0 %v2967_v54  ;;  %v1296_v60 = vadd.f32 %v1884_v22, %v1280_v21  ;;  %v1283_v33 = vadd.f32 %v2929_v18, %v1190_v25  ;;  %v1282_v34 = vadd.f32 %v2929_v18, %v1188_v24  ;;  %vm1310_vm13 = vcmp.gt.f32.partialorder %v1294_v16, 0.0  ;;  %p2475_p8 = pneg %p2474_p13 }
 0x5b5   : > { %v2993_v38 = vsel %vm1311_vm12, %v1295_v15, %v1327_v27  ;;  %v1329_v30 = vmul.f32 0.2, %v1297_v23  ;;  %v2995_v11 = vsel %vm1310_vm13, %v1294_v16, %v1326_v28  ;;  %vm1313_vm14 = vcmp.gt.f32.partialorder %v1297_v23, 0.0 }
 0x5b6   : > { %v1328_v39 = vmul.f32 0.2, %v1296_v60  ;;  %v1299_v14 = vadd.f32 %v1887_v37, %v1283_v33  ;;  %v1298_v40 = vadd.f32 %v1886_v0, %v1282_v34  ;;  %vm1312_vm15 = vcmp.gt.f32.partialorder %v1296_v60, 0.0  ;;  %p2482_p4 = pnand %p2481_p2, %p2475_p8 }
 0x5b7   : > { %v2999_v18 = vsel %vm1313_vm14, %v1297_v23, %v1329_v30  ;;  %vm1737_vm2 = vcmask 1041409   ;;  %vm1739_vm3 = vcmask 1042434   ;;  %vm1741_vm4 = vcmask 1043459  }
 0x5b8   : > { %1362 = vmax.xlane.f32.xlu1 %v2974_v13  ;;  %1360 = vmax.xlane.f32.xlu0 %v2977_v19  ;;  %v3001_v43 = vsel %vm1312_vm15, %v1296_v60, %v1328_v39  ;;  %v1331_v44 = vmul.f32 0.2, %v1299_v14  ;;  %v1330_v45 = vmul.f32 0.2, %v1298_v40  ;;  %vm1315_vm0 = vcmp.gt.f32.partialorder %v1299_v14, 0.0 }
 0x5b9   : > { %vm1314_vm1 = vcmp.gt.f32.partialorder %v1298_v40, 0.0  ;;  %vm1743_vm5 = vcmask 1044484   ;;  %vm1745_vm6 = vcmask 1045509   ;;  %vm1747_vm7 = vcmask 1046534  }
 0x5ba   : > { %v3005_v36 = vsel %vm1315_vm0, %v1299_v14, %v1331_v44  ;;  %v3007_v47 = vsel %vm1314_vm1, %v1298_v40, %v1330_v45  ;;  %vm1749_vm8 = vcmask 1047559  }
 0x5bc   : > { %1366 = vmax.xlane.f32.xlu1 %v2983_v26  ;;  %1364 = vmax.xlane.f32.xlu0 %v2985_v29 }
 0x5c0   : > { %1370 = vmax.xlane.f32.xlu1 %v2993_v38  ;;  %1368 = vmax.xlane.f32.xlu0 %v2995_v11 }
 0x5c4   : > { %1374 = vmax.xlane.f32.xlu1 %v2999_v18  ;;  %1372 = vmax.xlane.f32.xlu0 %v3001_v43 }
 0x5c8   : > { %1378 = vmax.xlane.f32.xlu1 %v3005_v36  ;;  %1376 = vmax.xlane.f32.xlu0 %v3007_v47 }
 0x639   : > { %v1351_v48 = vpop.xlane.xlu1 %1350  ;;  %v1349_v50 = vpop.xlane.xlu0 %1348 }
 0x63a   : > { %v1381_v51 = vsub.f32 %v2945_v35, %v1351_v48  ;;  %v1380_v52 = vsub.f32 %v2947_v46, %v1349_v50 }
 0x63c   : > { %v1398_v53 = vmul.f32 1.442695, %v1381_v51  ;;  %v1396_v55 = vmul.f32 1.442695, %v1380_v52 }
 0x63d   : > { %v1355_v32 = vpop.xlane.xlu1 %1354  ;;  %v1353_v31 = vpop.xlane.xlu0 %1352 }
 0x63e   : > { %2377 = vpow2.f32 %v1398_v53  ;;  %v1383_v58 = vsub.f32 %v2954_v56, %v1355_v32  ;;  %v1382_v42 = vsub.f32 %v2956_v57, %v1353_v31 }
 0x63f   : > { %2379 = vpow2.f32 %v1396_v55 }
 0x640   : > { %v1402_v41 = vmul.f32 1.442695, %v1383_v58  ;;  %v1400_v59 = vmul.f32 1.442695, %v1382_v42 }
 0x641   : > { %v1359_v62 = vpop.xlane.xlu1 %1358  ;;  %v1357_v1 = vpop.xlane.xlu0 %1356 }
 0x642   : > { %2381 = vpow2.f32 %v1402_v41  ;;  %v1385_v2 = vsub.f32 %v2963_v61, %v1359_v62  ;;  %v1384_v35 = vsub.f32 %v2967_v54, %v1357_v1 }
 0x643   : > { %2383 = vpow2.f32 %v1400_v59 }
 0x644   : > { %v1406_v46 = vmul.f32 1.442695, %v1385_v2  ;;  %v1404_v49 = vmul.f32 1.442695, %v1384_v35 }
 0x645   : > { %v1363_v3 = vpop.xlane.xlu1 %1362  ;;  %v1361_v4 = vpop.xlane.xlu0 %1360 }
 0x646   : > { %2385 = vpow2.f32 %v1406_v46  ;;  %v1387_v56 = vsub.f32 %v2974_v13, %v1363_v3  ;;  %v1386_v57 = vsub.f32 %v2977_v19, %v1361_v4 }
 0x647   : > { %2387 = vpow2.f32 %v1404_v49 }
 0x648   : > { %v2378_v63 = vpop.eup %2377  ;;  %v1410_v7 = vmul.f32 1.442695, %v1387_v56  ;;  %v1408_v5 = vmul.f32 1.442695, %v1386_v57 }
 0x649   : > { %v2380_v8 = vpop.eup %2379  ;;  %1430 = vadd.xlane.f32.xlu1 %v2378_v63  ;;  %v1367_v10 = vpop.xlane.xlu1 %1366 }
 0x64a   : > { %v1365_v61 = vpop.xlane.xlu0 %1364  ;;  %2389 = vpow2.f32 %v1410_v7  ;;  %v1389_v54 = vsub.f32 %v2983_v26, %v1367_v10  ;;  %1428 = vadd.xlane.f32.xlu0 %v2380_v8  ;;  %v1460_v15 = vpack.c.bf16 %v2378_v63, %v2380_v8  ;;  %v1607_v7 = vsub.s32 5, %v2711_v12 }
 0x64b   : > { %v1388_v9 = vsub.f32 %v2985_v29, %v1365_v61  ;;  %2391 = vpow2.f32 %v1408_v5 }
 0x64c   : > { %v2382_v16 = vpop.eup %2381  ;;  %v1414_v13 = vmul.f32 1.442695, %v1389_v54  ;;  %2179 = vmatprep.mubr.bf16.mxu0 %v1460_v15  ;;  %v3029_v8 = vrot.slane %v2924_v6, %v1607_v7 }
 0x64d   : > { %v1412_v17 = vmul.f32 1.442695, %v1388_v9  ;;  %v2384_v19 = vpop.eup %2383  ;;  %v1371_v20 = vpop.xlane.xlu1 %1370 }
 0x64e   : > { %v1369_v21 = vpop.xlane.xlu0 %1368  ;;  %2393 = vpow2.f32 %v1414_v13  ;;  %v1391_v22 = vsub.f32 %v2993_v38, %v1371_v20  ;;  %v1461_v24 = vpack.c.bf16 %v2382_v16, %v2384_v19 }
 0x64f   : > { %v1390_v23 = vsub.f32 %v2995_v11, %v1369_v21  ;;  %2395 = vpow2.f32 %v1412_v17 }
 0x650   : > { %v2386_v25 = vpop.eup %2385  ;;  %v1418_v26 = vmul.f32 1.442695, %v1391_v22  ;;  %2180 = vmatmul.mubr.bf16.vlgmr.msra.gmra.mrb[48].mxu0 %v1461_v24 }
 0x651   : > { %v1416_v27 = vmul.f32 1.442695, %v1390_v23  ;;  %v2388_v28 = vpop.eup %2387  ;;  %v1375_v29 = vpop.xlane.xlu1 %1374 }
 0x652   : > { %v1373_v60 = vpop.xlane.xlu0 %1372  ;;  %2397 = vpow2.f32 %v1418_v26  ;;  %v1393_v33 = vsub.f32 %v2999_v18, %v1375_v29  ;;  %v1462_v37 = vpack.c.bf16 %v2386_v25, %v2388_v28 }
 0x653   : > { %v1392_v34 = vsub.f32 %v3001_v43, %v1373_v60  ;;  %2399 = vpow2.f32 %v1416_v27 }
 0x654   : > { %v2390_v0 = vpop.eup %2389  ;;  %v1422_v38 = vmul.f32 1.442695, %v1393_v33  ;;  %2183 = vmatprep.mubr.bf16.mxu0 %v1462_v37 }
 0x655   : > { %v1420_v30 = vmul.f32 1.442695, %v1392_v34  ;;  %v2392_v11 = vpop.eup %2391  ;;  %v1379_v39 = vpop.xlane.xlu1 %1378 }
 0x656   : > { %v1377_v14 = vpop.xlane.xlu0 %1376  ;;  %2401 = vpow2.f32 %v1422_v38  ;;  %v1395_v40 = vsub.f32 %v3005_v36, %v1379_v39  ;;  %v1463_v45 = vpack.c.bf16 %v2390_v0, %v2392_v11 }
 0x657   : > { %v1394_v44 = vsub.f32 %v3007_v47, %v1377_v14  ;;  %2403 = vpow2.f32 %v1420_v30 }
 0x658   : > { %v2394_v48 = vpop.eup %2393  ;;  %v1426_v18 = vmul.f32 1.442695, %v1395_v40  ;;  %2184 = vmatmul.mubr.bf16.gmra.mrb[52].mxu0 %v1463_v45 }
 0x659   : > { %v1424_v50 = vmul.f32 1.442695, %v1394_v44  ;;  %v2396_v43 = vpop.eup %2395  ;;  %1446 = vadd.xlane.f32.xlu1 %v2394_v48 }
 0x65a   : > { %2405 = vpow2.f32 %v1426_v18  ;;  %1444 = vadd.xlane.f32.xlu0 %v2396_v43  ;;  %v1464_v51 = vpack.c.bf16 %v2394_v48, %v2396_v43 }
 0x65b   : > { %2407 = vpow2.f32 %v1424_v50 }
 0x65c   : > { %v2398_v52 = vpop.eup %2397  ;;  %2187 = vmatprep.mubr.bf16.mxu0 %v1464_v51 }
 0x65d   : > { %v2400_v53 = vpop.eup %2399 }
 0x65e   : > { %1432 = vadd.xlane.f32.xlu0 %v2384_v19  ;;  %1448 = vadd.xlane.f32.xlu1 %v2400_v53  ;;  %v1465_v36 = vpack.c.bf16 %v2398_v52, %v2400_v53 }
 0x660   : > { %v2402_v55 = vpop.eup %2401  ;;  %2188 = vmatmul.mubr.bf16.gmra.mrb[56].mxu0 %v1465_v36 }
 0x661   : > { %v2404_v47 = vpop.eup %2403 }
 0x662   : > { %1434 = vadd.xlane.f32.xlu0 %v2382_v16  ;;  %1450 = vadd.xlane.f32.xlu1 %v2398_v52  ;;  %v1466_v32 = vpack.c.bf16 %v2402_v55, %v2404_v47 }
 0x664   : > { %v2406_v31 = vpop.eup %2405  ;;  %2191 = vmatprep.mubr.bf16.mxu0 %v1466_v32 }
 0x665   : > { %v2408_v58 = vpop.eup %2407 }
 0x666   : > { %1436 = vadd.xlane.f32.xlu0 %v2388_v28  ;;  %1452 = vadd.xlane.f32.xlu1 %v2404_v47  ;;  %v1467_v42 = vpack.c.bf16 %v2406_v31, %v2408_v58 }
 0x668   : > { %2192 = vmatmul.mubr.bf16.gmra.mrb[60].mxu0 %v1467_v42 }
 0x66a   : > { %1438 = vadd.xlane.f32.xlu0 %v2386_v25  ;;  %1454 = vadd.xlane.f32.xlu1 %v2402_v55 }
 0x66e   : > { %1440 = vadd.xlane.f32.xlu0 %v2392_v11  ;;  %1456 = vadd.xlane.f32.xlu1 %v2408_v58 }
 0x672   : > { %1442 = vadd.xlane.f32.xlu0 %v2390_v0  ;;  %1458 = vadd.xlane.f32.xlu1 %v2406_v31 }
 0x6d6   : > { %v1431_v62 = vpop.xlane.xlu1 %1430 }
 0x6d7   : > { %v1429_v41 = vpop.xlane.xlu0 %1428 }
 0x6e6   : > { %v1447_v2 = vpop.xlane.xlu1 %1446 }
 0x6e7   : > { %v1445_v59 = vpop.xlane.xlu0 %1444 }
 0x6eb   : > { %v1433_v1 = vpop.xlane.xlu0 %1432  ;;  %v1449_v46 = vpop.xlane.xlu1 %1448 }
 0x6ec   : > { %2409 = vrcp.f32 %v1433_v1 }
 0x6ed   : > { %2411 = vrcp.f32 %v1429_v41 }
 0x6ef   : > { %v1435_v35 = vpop.xlane.xlu0 %1434  ;;  %v1451_v3 = vpop.xlane.xlu1 %1450 }
 0x6f0   : > { %2413 = vrcp.f32 %v1435_v35 }
 0x6f1   : > { %2415 = vrcp.f32 %v1431_v62 }
 0x6f3   : > { %v1437_v49 = vpop.xlane.xlu0 %1436  ;;  %v1453_v56 = vpop.xlane.xlu1 %1452 }
 0x6f6   : > { %v2410_v10 = vpop.eup %2409 }
 0x6f7   : > { %v1439_v4 = vpop.xlane.xlu0 %1438  ;;  %v1455_v63 = vpop.xlane.xlu1 %1454 }
 0x6f8   : > { %v2412_v54 = vpop.eup %2411 }
 0x6fa   : > { %v2414_v13 = vpop.eup %2413 }
 0x6fb   : > { %v1441_v57 = vpop.xlane.xlu0 %1440  ;;  %v1457_v9 = vpop.xlane.xlu1 %1456 }
 0x6fc   : > { %2417 = vrcp.f32 %v1441_v57  ;;  %v2416_v20 = vpop.eup %2415 }
 0x6fd   : > { %2419 = vrcp.f32 %v1437_v49 }
 0x6ff   : > { %v1443_v5 = vpop.xlane.xlu0 %1442  ;;  %v1459_v28 = vpop.xlane.xlu1 %1458 }
 0x700   : > { %2421 = vrcp.f32 %v1443_v5 }
 0x701   : > { %2423 = vrcp.f32 %v1439_v4 }
 0x702   : > { %2425 = vrcp.f32 %v1447_v2 }
 0x703   : > { %2427 = vrcp.f32 %v1445_v59 }
 0x704   : > { %2429 = vrcp.f32 %v1449_v46 }
 0x705   : > { %2431 = vrcp.f32 %v1451_v3 }
 0x706   : > { %2433 = vrcp.f32 %v1453_v56  ;;  %v2418_v33 = vpop.eup %2417 }
 0x707   : > { %2435 = vrcp.f32 %v1455_v63  ;;  %v2420_v38 = vpop.eup %2419 }
 0x708   : > { %2437 = vrcp.f32 %v1457_v9 }
 0x709   : > { %2439 = vrcp.f32 %v1459_v28 }
 0x70a   : > { %v2422_v40 = vpop.eup %2421 }
 0x70b   : > { %v2424_v50 = vpop.eup %2423 }
 0x70c   : > { %v2426_v58 = vpop.eup %2425 }
 0x70d   : > { %v2428_v1 = vpop.eup %2427 }
 0x70e   : > { %v2430_v3 = vpop.eup %2429 }
 0x70f   : > { %v2432_v7 = vpop.eup %2431 }
 0x723   : > { %v2181_v61 = vpop.f32.mrb[48].mxu0 }
 0x724   : > { %v1591_v15 = vmul.f32 %v2410_v10, %v2181_v61  ;;  %v1510_v16 = vpop.f32.mrb[49].mxu0 }
 0x725   : > { %v1589_v17 = vmul.f32 %v2412_v54, %v1510_v16  ;;  %v2182_v19 = vpop.f32.mrb[50].mxu0 }
 0x726   : > { %v1611_v12 = vadd.f32 %v3029_v8, %v1591_v15  ;;  %v1592_v21 = vmul.f32 %v2414_v13, %v2182_v19  ;;  %v1513_v22 = vpop.f32.mrb[51].mxu0  ;;  %v2434_v15 = vpop.eup %2433 }
 0x727   : > { %v1609_v6 = vadd.f32 %v3029_v8, %v1589_v17  ;;  %v1590_v23 = vmul.f32 %v2416_v20, %v1513_v22 }
 0x728   : > { %v1637_v24 = vrot.slane %v1611_v12, 4  ;;  %v1612_v25 = vadd.f32 %v3029_v8, %v1592_v21 }
 0x729   : > { %v1625_v26 = vrot.slane %v1609_v6, 4  ;;  %v1610_v27 = vadd.f32 %v3029_v8, %v1590_v23 }
 0x72a   : > { %v1638_v29 = vadd.f32 %v1637_v24, %v1611_v12  ;;  %v1643_v60 = vrot.slane %v1612_v25, 4  ;;  %v3039_v12 = vpop.eup %2435 }
 0x72b   : > { %v1626_v34 = vadd.f32 %v1625_v26, %v1609_v6  ;;  %v1631_v37 = vrot.slane %v1610_v27, 4  ;;  %v2185_v0 = vpop.f32.mrb[52].mxu0 }
 0x72c   : > { %v1639_v30 = vrot.slane %v1638_v29, 2  ;;  %v1644_v11 = vadd.f32 %v1643_v60, %v1612_v25  ;;  %v1595_v39 = vmul.f32 %v2418_v33, %v2185_v0  ;;  %v1526_v14 = vpop.f32.mrb[53].mxu0  ;;  %v2438_v25 = vpop.eup %2437 }
 0x72d   : > { %v1627_v44 = vrot.slane %v1626_v34, 2  ;;  %v1632_v45 = vadd.f32 %v1631_v37, %v1610_v27  ;;  %v1593_v48 = vmul.f32 %v2420_v38, %v1526_v14  ;;  %v2186_v18 = vpop.f32.mrb[54].mxu0  ;;  %v2440_v33 = vpop.eup %2439 }
 0x72e   : > { %v1640_v43 = vadd.f32 %v1639_v30, %v1638_v29  ;;  %v1645_v51 = vrot.slane %v1644_v11, 2  ;;  %v1615_v52 = vadd.f32 %v3029_v8, %v1595_v39  ;;  %v1596_v53 = vmul.f32 %v2422_v40, %v2186_v18  ;;  %v1529_v36 = vpop.f32.mrb[55].mxu0 }
 0x72f   : > { %v1628_v55 = vadd.f32 %v1627_v44, %v1626_v34  ;;  %v1633_v47 = vrot.slane %v1632_v45, 2  ;;  %v1613_v32 = vadd.f32 %v3029_v8, %v1593_v48  ;;  %v1594_v31 = vmul.f32 %v2424_v50, %v1529_v36 }
 0x730   : > { %v1641_v42 = vrot.slane %v1640_v43, 1  ;;  %v1646_v41 = vadd.f32 %v1645_v51, %v1644_v11  ;;  %v1661_v59 = vrot.slane %v1615_v52, 4  ;;  %v1616_v62 = vadd.f32 %v3029_v8, %v1596_v53 }
 0x731   : > { %v1629_v2 = vrot.slane %v1628_v55, 1  ;;  %v1634_v35 = vadd.f32 %v1633_v47, %v1632_v45  ;;  %v1649_v46 = vrot.slane %v1613_v32, 4  ;;  %v1614_v49 = vadd.f32 %v3029_v8, %v1594_v31 }
 0x732   : > { %v1642_v4 = vadd.f32 %v1641_v42, %v1640_v43  ;;  %v1647_v56 = vrot.slane %v1646_v41, 1  ;;  %v1662_v57 = vadd.f32 %v1661_v59, %v1615_v52  ;;  %v1667_v63 = vrot.slane %v1616_v62, 4 }
 0x733   : > { %v1630_v5 = vadd.f32 %v1629_v2, %v1628_v55  ;;  %v1635_v10 = vrot.slane %v1634_v35, 1  ;;  %v1650_v61 = vadd.f32 %v1649_v46, %v1613_v32  ;;  %v1655_v54 = vrot.slane %v1614_v49, 4  ;;  %v2189_v9 = vpop.f32.mrb[56].mxu0 }
 0x734   : > { %v1648_v16 = vadd.f32 %v1647_v56, %v1646_v41  ;;  %v1663_v13 = vrot.slane %v1662_v57, 2  ;;  %v1668_v17 = vadd.f32 %v1667_v63, %v1616_v62  ;;  %v1599_v19 = vmul.f32 %v2430_v3, %v2189_v9  ;;  %v1542_v20 = vpop.f32.mrb[57].mxu0 }
 0x735   : > { %v1636_v21 = vadd.f32 %v1635_v10, %v1634_v35  ;;  %v1651_v22 = vrot.slane %v1650_v61, 2  ;;  %v1656_v6 = vadd.f32 %v1655_v54, %v1614_v49  ;;  %v1597_v23 = vmul.f32 %v2428_v1, %v1542_v20  ;;  %v2190_v24 = vpop.f32.mrb[58].mxu0 }
 0x736   : > { %v1664_v26 = vadd.f32 %v1663_v13, %v1662_v57  ;;  %v1669_v27 = vrot.slane %v1668_v17, 2  ;;  %v1619_v28 = vadd.f32 %v3029_v8, %v1599_v19  ;;  %v1600_v29 = vmul.f32 %v2432_v7, %v2190_v24  ;;  %v1545_v60 = vpop.f32.mrb[59].mxu0 }
 0x737   : > { %v1738_v34 = vsel %vm1737_vm2, %v1636_v21, %v1630_v5  ;;  %v1652_v37 = vadd.f32 %v1651_v22, %v1650_v61  ;;  %v1657_v0 = vrot.slane %v1656_v6, 2  ;;  %v1617_v38 = vadd.f32 %v3029_v8, %v1597_v23 }
 0x738   : > { %v1740_v30 = vsel %vm1739_vm3, %v1642_v4, %v1738_v34  ;;  %v1665_v11 = vrot.slane %v1664_v26, 1  ;;  %v1670_v39 = vadd.f32 %v1669_v27, %v1668_v17  ;;  %v1685_v14 = vrot.slane %v1619_v28, 4 }
 0x739   : > { %v1653_v40 = vrot.slane %v1652_v37, 1  ;;  %v1742_v44 = vsel %vm1741_vm4, %v1648_v16, %v1740_v30  ;;  %v1658_v45 = vadd.f32 %v1657_v0, %v1656_v6  ;;  %v1673_v48 = vrot.slane %v1617_v38, 4 }
 0x73a   : > { %v1671_v18 = vrot.slane %v1670_v39, 1  ;;  %v1686_v50 = vadd.f32 %v1685_v14, %v1619_v28  ;;  %v1620_v43 = vadd.f32 %v3029_v8, %v1600_v29  ;;  %v1598_v36 = vmul.f32 %v2426_v58, %v1545_v60 }
 0x73b   : > { %v1654_v51 = vadd.f32 %v1653_v40, %v1652_v37  ;;  %v1659_v52 = vrot.slane %v1658_v45, 1  ;;  %v1674_v53 = vadd.f32 %v1673_v48, %v1617_v38  ;;  %v2193_v55 = vpop.f32.mrb[60].mxu0  ;;  %v1666_v47 = vadd.f32 %v1665_v11, %v1664_v26 }
 0x73c   : > { %v1691_v32 = vrot.slane %v1620_v43, 4  ;;  %v1603_v31 = vmul.f32 %v2438_v25, %v2193_v55  ;;  %v1558_v42 = vpop.f32.mrb[61].mxu0  ;;  %v1618_v1 = vadd.f32 %v3029_v8, %v1598_v36  ;;  %v1687_v35 = vrot.slane %v1686_v50, 2 }
 0x73d   : > { %v1744_v41 = vsel %vm1743_vm5, %v1654_v51, %v1742_v44  ;;  %v1660_v59 = vadd.f32 %v1659_v52, %v1658_v45  ;;  %v1675_v62 = vrot.slane %v1674_v53, 2  ;;  %v2194_v2 = vpop.f32.mrb[62].mxu0  ;;  %v1601_v3 = vmul.f32 %v2434_v15, %v1558_v42 }
 0x73e   : > { %v1692_v46 = vadd.f32 %v1691_v32, %v1620_v43  ;;  %v1623_v49 = vadd.f32 %v3029_v8, %v1603_v31  ;;  %v1561_v58 = vpop.f32.mrb[63].mxu0  ;;  %v1672_v4 = vadd.f32 %v1671_v18, %v1670_v39  ;;  %v1679_v57 = vrot.slane %v1618_v1, 4 }
 0x73f   : > { %v1746_v56 = vsel %vm1745_vm6, %v1660_v59, %v1744_v41  ;;  %v1604_v63 = vmul.f32 %v2440_v33, %v2194_v2  ;;  %v1676_v54 = vadd.f32 %v1675_v62, %v1674_v53  ;;  %v1621_v16 = vadd.f32 %v3029_v8, %v1601_v3 }
 0x740   : > { %v1748_v7 = vsel %vm1747_vm7, %v1666_v47, %v1746_v56  ;;  %v1693_v5 = vrot.slane %v1692_v46, 2  ;;  %v1709_v10 = vrot.slane %v1623_v49, 4  ;;  %v1680_v9 = vadd.f32 %v1679_v57, %v1618_v1 }
 0x741   : > { %v1750_v61 = vsel %vm1749_vm8, %v1672_v4, %v1748_v7  ;;  %v1688_v13 = vadd.f32 %v1687_v35, %v1686_v50  ;;  %v1624_v15 = vadd.f32 %v3029_v8, %v1604_v63  ;;  %v1697_v21 = vrot.slane %v1621_v16, 4 }
 0x742   : > { %v1694_v17 = vadd.f32 %v1693_v5, %v1692_v46  ;;  %v1710_v19 = vadd.f32 %v1709_v10, %v1623_v49  ;;  %1760 = vst [vmem:[%s3056_s26] sm:$0xff] %v1750_v61  ;;  %v1681_v20 = vrot.slane %v1680_v9, 2  ;;  %v1602_v22 = vmul.f32 %v3039_v12, %v1561_v58 }
 0x743   : > { %v1715_v6 = vrot.slane %v1624_v15, 4  ;;  %v1677_v23 = vrot.slane %v1676_v54, 1  ;;  %v1698_v25 = vadd.f32 %v1697_v21, %v1621_v16  ;;  %v1689_v27 = vrot.slane %v1688_v13, 1 }
 0x744   : > { %v1682_v24 = vadd.f32 %v1681_v20, %v1680_v9  ;;  %v1622_v26 = vadd.f32 %v3029_v8, %v1602_v22  ;;  %v1695_v28 = vrot.slane %v1694_v17, 1  ;;  %v1711_v29 = vrot.slane %v1710_v19, 2 }
 0x745   : > { %v1716_v60 = vadd.f32 %v1715_v6, %v1624_v15  ;;  %v1699_v34 = vrot.slane %v1698_v25, 2  ;;  %v1678_v38 = vadd.f32 %v1677_v23, %v1676_v54  ;;  %v1690_v12 = vadd.f32 %v1689_v27, %v1688_v13 }
 0x746   : > { %v1683_v33 = vrot.slane %v1682_v24, 1  ;;  %v1703_v37 = vrot.slane %v1622_v26, 4  ;;  %v1696_v14 = vadd.f32 %v1695_v28, %v1694_v17  ;;  %v1712_v40 = vadd.f32 %v1711_v29, %v1710_v19 }
 0x747   : > { %v1717_v0 = vrot.slane %v1716_v60, 2  ;;  %v1700_v11 = vadd.f32 %v1699_v34, %v1698_v25 }
 0x748   : > { %v1684_v30 = vadd.f32 %v1683_v33, %v1682_v24  ;;  %v1704_v39 = vadd.f32 %v1703_v37, %v1622_v26  ;;  %v1713_v52 = vrot.slane %v1712_v40, 1 }
 0x749   : > { %v1701_v8 = vrot.slane %v1700_v11, 1  ;;  %v1718_v45 = vadd.f32 %v1717_v0, %v1716_v60 }
 0x74a   : > { %v1751_v44 = vsel %vm1737_vm2, %v1684_v30, %v1678_v38  ;;  %v1705_v48 = vrot.slane %v1704_v39, 2  ;;  %v1714_v32 = vadd.f32 %v1713_v52, %v1712_v40 }
 0x74b   : > { %v1752_v18 = vsel %vm1739_vm3, %v1690_v12, %v1751_v44  ;;  %v1702_v50 = vadd.f32 %v1701_v8, %v1700_v11  ;;  %v1719_v36 = vrot.slane %v1718_v45, 1 }
 0x74c   : > { %v1753_v43 = vsel %vm1741_vm4, %v1696_v14, %v1752_v18  ;;  %v1706_v51 = vadd.f32 %v1705_v48, %v1704_v39 }
 0x74d   : > { %v1754_v53 = vsel %vm1743_vm5, %v1702_v50, %v1753_v43  ;;  %v1720_v31 = vadd.f32 %v1719_v36, %v1718_v45 }
 0x74e   : > { %v1707_v55 = vrot.slane %v1706_v51, 1 }
 0x750   : > { %v1708_v47 = vadd.f32 %v1707_v55, %v1706_v51 }
 0x752   : > { %v1755_v42 = vsel %vm1745_vm6, %v1708_v47, %v1754_v53 }
 0x753   : > { %v1756_v41 = vsel %vm1747_vm7, %v1714_v32, %v1755_v42 }
 0x754   : > { %v1757_v59 = vsel %vm1749_vm8, %v1720_v31, %v1756_v41 }
 0x755   : > { %1761 = vst [vmem:[%s3056_s26 + $0x8] sm:$0xff] %v1757_v59 }
 0x756   : > { %2485 = shalt.err (!%p2482_p4)
}
 0x757   : > { %s2486_s11 = scalar_lea.hbm %s3071_s8, 256  ;;  %s2490_s25 = scalar_lea.hbm %s3125_s5, 512 }
 0x758   : > { %p2487_p5 = scmp.ne.s32.totalorder %s3071_s8, %s2486_s11  ;;  %p2491_p1 = scmp.lt.u32.totalorder %s3071_s8, %s3125_s5 }
 0x759   : > { %p2492_p3 = scmp.lt.u32.totalorder %s2490_s25, %s2486_s11  ;;  %p2494_p6 = scmp.lt.u32.totalorder %s2486_s11, %s3071_s8 }
 0x75a   : > { %p2488_p7 = pnand %p2487_p5, %p3132_p12 }
 0x75b   : > { %p2493_p11 = por %p2492_p3, %p2491_p1 }
 0x75c   : > { %p2489_p9 = pneg %p2488_p7 }
 0x75d   : > { %p2495_p13 = por %p2494_p6, %p2493_p11 }
 0x75f   : > { %p2496_p8 = pnand %p2495_p13, %p2489_p9 }
 0x761   : > { %2499 = shalt.err (!%p2496_p8)
}
 0x762   : > { %s2547_s12 = smov 128   ;;  %s2548_s15 = smov 8  }
 0x763   : > { %2245 = dma.vmem_to_hbm [thread:$0]  (%p3132_p12), %s3073_s14, 256, %s3071_s8, %s1763_s22, %s2547_s12, %s2547_s12, %s2548_s15  }
 0x764 PF: > { %s1791_s16 = sand.u32 1, %s2526_s18   ;;  %p3133_p10 = scmp.ne.s32.totalorder %s3130_s6, 0 }
 0x765   : > { %p3134_p0 = scmp.ge.s32.totalorder %s2538_s21, 2  ;;  %s1792_s7 = scalar_lea.sflag [#allocation4], %s1791_s16 }
 0x767   : > { %p2252_p2 = pnand %p3134_p0, %p3133_p10 }
 0x769   : > { %2521 = dma.done.wait (!%p2252_p2), %s1792_s7, 256  }
 0x76a   : > { %2523 = vsyncadd (!%p2252_p2), %s1792_s7, 4294967040  ;;  %p18_p4 = scmp.ge.s32.totalorder %s2604_s24, 4   ;;  %s3135_s18 = smov %s2530_s19 }
 0x76b   : > { %s3136_s19 = smov %s2534_s20  ;;  %s3137_s20 = smov %s2616_s27 }
 0x76c   : > { %s3138_s21 = smov %s2604_s24  ;;  %20 = sbr.rel (!%p18_p4) target bundleno = 5 (0x5), region = 89 }
 0x773   :  { %1797 = vsyncpa [#allocation3], 1 }
 0x774   :  { %1799 = vsyncpa [#allocation3 + $0x1], 1 }
 0x775   :  { %1800 = vsyncpa [#allocation4], 1 }
 0x776   :  { %1802 = vsyncpa [#allocation4 + $0x1], 1 }

</bundles_post_ra>
